<compile_context>
chip_gen: v5e
topology: v5e:2x2
jax: 0.10.0
libtpu: 0.0.40
codegen_flags: <defaults>
</compile_context>

<pallas_src>
import jax
import jax.numpy as jnp
from jax.experimental import pallas as pl
from jax.experimental.pallas import tpu as pltpu

IMG_FEATS = 784          # 28*28
K_IN = 896               # packed contraction dim: 784 img + 10 labels, padded to 7*128
H1 = 512
H2 = 256


def _round_up(x, m):
    return (x + m - 1) // m * m


def _disc_kernel(x_ref, w1_ref, b1_ref, w2_ref, b2_ref, w3_ref, b3_ref, out_ref):
    # Layer 1: Linear(1568, 512) with the label embedding folded in
    # algebraically and img/labels packed into one K=896 contraction.
    # bf16 operands on the MXU, f32 accumulation, f32 bias + LeakyReLU.
    h1 = jnp.dot(x_ref[...], w1_ref[...],
                 preferred_element_type=jnp.float32) + b1_ref[...]
    h1 = jnp.maximum(h1, 0.2 * h1)                 # LeakyReLU(0.2)
    # TODO(synk): nn.Dropout(0.3) is stochastic in train mode; identity here
    # (eval-mode forward semantics).

    # Layer 2: Linear(512, 256) + LeakyReLU(0.2).
    h2 = jnp.dot(h1.astype(jnp.bfloat16), w2_ref[...],
                 preferred_element_type=jnp.float32) + b2_ref[...]
    h2 = jnp.maximum(h2, 0.2 * h2)

    # Layer 3: Linear(256, 1) + Sigmoid. N=1 matmul replaced by a VPU multiply
    # + cross-lane reduce (keeps the MXU free); sigmoid evaluated once per row
    # on the [tb, 1] column and stored into a narrow [tb, 1] output block.
    logit = jnp.sum(h2 * w3_ref[...], axis=-1, keepdims=True) + b3_ref[...]
    out_ref[...] = jax.nn.sigmoid(logit)


def prepare_params(params):
    """One-time prep: fold label_emb into layer 1, pack, pad, cast to bf16.

    Call this ONCE outside the hot path and pass the result to
    discriminator_forward (avoids re-reading / re-casting ~3 MiB of f32
    weights on every call).
    """
    w_emb, b_emb, w1, b1, w2, b2, w3, b3 = params
    w1a = w1[:IMG_FEATS, :]               # multiplies the flattened image
    w1b = w1[IMG_FEATS:, :]               # multiplies the label embedding
    wf = w_emb @ w1b                       # [10, 512]  exact algebraic fold
    b1f = b1 + b_emb @ w1b                 # [512]

    # Pack [W1a ; W_emb@W1b] into one contraction matrix, pad rows to K_IN.
    w1_packed = jnp.concatenate([w1a, wf], axis=0)            # [794, 512]
    w1_packed = jnp.pad(w1_packed, ((0, K_IN - w1_packed.shape[0]), (0, 0)))

    return (w1_packed.astype(jnp.bfloat16),                   # [896, 512] bf16
            b1f.reshape(1, H1).astype(jnp.float32),            # [1, 512]  f32
            w2.astype(jnp.bfloat16),                           # [512, 256] bf16
            b2.reshape(1, H2).astype(jnp.float32),              # [1, 256]  f32
            w3.reshape(1, H2).astype(jnp.float32),               # [1, 256]  f32
            b3.reshape(1, 1).astype(jnp.float32))                 # [1, 1]    f32


def _choose_tiling(B):
    """Pick (padded_batch, tile_rows). Static Python ints at trace time."""
    bp = _round_up(B, 16)          # 16-row alignment (bf16 sublane packing)
    if bp <= 256:
        return bp, bp              # one small tile; batch too small to split
    # Tiles of <= 512 rows, and >= 2 grid steps so both v7x TensorCores work.
    tb = min(512, _round_up(pl.cdiv(bp, 2), 16))
    bp = _round_up(bp, tb)
    return bp, tb


@jax.jit
def discriminator_forward(img, labels, prepped):
    """img: [B, 1, 28, 28] f32 (NCHW), labels: [B, 10] f32 -> [B, 1] f32."""
    w1p, b1f, w2b, b2r, w3r, b3r = prepped
    B = img.shape[0]

    # Flatten exactly like torch's img.view(B, -1), pack labels next to it,
    # pad the contraction dim to 896, cast to bf16 (f32 accumulation in-kernel).
    x = jnp.concatenate([img.reshape(B, IMG_FEATS), labels.astype(img.dtype)],
                        axis=1)                                 # [B, 794]
    x = jnp.pad(x, ((0, 0), (0, K_IN - x.shape[1]))).astype(jnp.bfloat16)

    bp, tb = _choose_tiling(B)
    if bp != B:
        x = jnp.pad(x, ((0, bp - B), (0, 0)))

    grid = (bp // tb,)

    def const_spec(shape):
        return pl.BlockSpec(shape, lambda i: (0, 0))   # resident across the grid

    out = pl.pallas_call(
        _disc_kernel,
        out_shape=jax.ShapeDtypeStruct((bp, 1), jnp.float32),
        grid=grid,
        in_specs=[
            pl.BlockSpec((tb, K_IN), lambda i: (i, 0)),  # packed activations bf16
            const_spec((K_IN, H1)),                      # packed W1       bf16
            const_spec((1, H1)),                         # fused bias 1    f32
            const_spec((H1, H2)),                        # W2              bf16
            const_spec((1, H2)),                         # b2              f32
            const_spec((1, H2)),                         # w3 row          f32
            const_spec((1, 1)),                          # b3              f32
        ],
        out_specs=pl.BlockSpec((tb, 1), lambda i: (i, 0)),
        compiler_params=pltpu.CompilerParams(
            dimension_semantics=("parallel",),
            vmem_limit_bytes=32 << 20,
        ),
    )(x, w1p, b1f, w2b, b2r, w3r, b3r)

    return out[:B]


def init_params(key, digit_dim=10):
    """Deterministic parameter init (PyTorch-Linear-style uniform bounds).

    Weights stored as [in_features, out_features] (transposed vs torch) so the
    kernel computes x @ W directly.
    """
    def linear(key, fan_in, fan_out):
        kw, kb = jax.random.split(key)
        bound = 1.0 / jnp.sqrt(jnp.float32(fan_in))
        w = jax.random.uniform(kw, (fan_in, fan_out), jnp.float32, -bound, bound)
        b = jax.random.uniform(kb, (fan_out,), jnp.float32, -bound, bound)
        return w, b

    k0, k1, k2, k3 = jax.random.split(key, 4)
    w_emb, b_emb = linear(k0, digit_dim, 784)     # label_emb: Linear(10, 784)
    w1, b1 = linear(k1, 784 * 2, 512)             # Linear(1568, 512)
    w2, b2 = linear(k2, 512, 256)                 # Linear(512, 256)
    w3, b3 = linear(k3, 256, 1)                   # Linear(256, 1)
    return (w_emb, b_emb, w1, b1, w2, b2, w3, b3)


def _reference_forward(img, labels, params):
    """Pure-JAX f32 reference (same math, no Pallas) for correctness."""
    (w_emb, b_emb, w1, b1, w2, b2, w3, b3) = params
    B = img.shape[0]
    x_img = img.reshape(B, -1)
    emb = labels @ w_emb + b_emb
    x = jnp.concatenate([x_img, emb], axis=1)
    h1 = x @ w1 + b1
    h1 = jnp.where(h1 > 0, h1, 0.2 * h1)
    h2 = h1 @ w2 + b2
    h2 = jnp.where(h2 > 0, h2, 0.2 * h2)
    return jax.nn.sigmoid(h2 @ w3 + b3)


if __name__ == "__main__":
    key = jax.random.PRNGKey(0)
    k_params, k_img, k_lab = jax.random.split(key, 3)

    params = init_params(k_params, digit_dim=10)
    prepped = prepare_params(params)              # one-time weight prep (hoisted)

    B = 2
    img = jax.random.normal(k_img, (B, 1, 28, 28), dtype=jnp.float32)  # NCHW
    labels = jax.nn.one_hot(
        jax.random.randint(k_lab, (B,), 0, 10), 10, dtype=jnp.float32)  # [B, 10]

    out = discriminator_forward(img, labels, prepped)
    out = jax.block_until_ready(out)

    ref = _reference_forward(img, labels, params)
    assert out.shape == (B, 1), out.shape
    # bf16 matmul operands (f32 accumulation) -> loosened tolerance vs f32 ref.
    assert jnp.allclose(out, ref, atol=2e-2, rtol=0.0), (out, ref)

    print("KERNEL_OK")
</pallas_src>

<mosaic_0001>
module attributes {stable_mosaic.version = 11 : i64} {
  func.func @_disc_kernel(%arg0: i32, %arg1: memref<16x896xbf16, #tpu.memory_space<vmem>>, %arg2: memref<896x512xbf16, #tpu.memory_space<vmem>>, %arg3: memref<1x512xf32, #tpu.memory_space<vmem>>, %arg4: memref<512x256xbf16, #tpu.memory_space<vmem>>, %arg5: memref<1x256xf32, #tpu.memory_space<vmem>>, %arg6: memref<1x256xf32, #tpu.memory_space<vmem>>, %arg7: memref<1x1xf32, #tpu.memory_space<vmem>>, %arg8: memref<16x1xf32, #tpu.memory_space<vmem>>) attributes {dimension_semantics = [#tpu.dimension_semantics<parallel>], iteration_bounds = array<i64: 1>, scalar_prefetch = 0 : i64, scratch_operands = 0 : i64, tpu.core_type = #tpu.core_type<tc>, window_params = [{transform_indices = @transform_0, window_bounds = array<i64: 16, 896>}, {pipeline_mode = #tpu.pipeline_mode<synchronous>, transform_indices = @transform_1, window_bounds = array<i64: 896, 512>}, {pipeline_mode = #tpu.pipeline_mode<synchronous>, transform_indices = @transform_2, window_bounds = array<i64: 1, 512>}, {pipeline_mode = #tpu.pipeline_mode<synchronous>, transform_indices = @transform_3, window_bounds = array<i64: 512, 256>}, {pipeline_mode = #tpu.pipeline_mode<synchronous>, transform_indices = @transform_4, window_bounds = array<i64: 1, 256>}, {pipeline_mode = #tpu.pipeline_mode<synchronous>, transform_indices = @transform_5, window_bounds = array<i64: 1, 256>}, {pipeline_mode = #tpu.pipeline_mode<synchronous>, transform_indices = @transform_6, window_bounds = array<i64: 1, 1>}, {transform_indices = @transform_7, window_bounds = array<i64: 16, 1>}]} {
    %c0 = arith.constant 0 : index
    %c0_0 = arith.constant 0 : index
    %0 = vector.load %arg1[%c0, %c0_0] : memref<16x896xbf16, #tpu.memory_space<vmem>>, vector<16x896xbf16>
    %c0_1 = arith.constant 0 : index
    %c0_2 = arith.constant 0 : index
    %1 = vector.load %arg2[%c0_1, %c0_2] : memref<896x512xbf16, #tpu.memory_space<vmem>>, vector<896x512xbf16>
    %cst = arith.constant dense<0.000000e+00> : vector<16x512xf32>
    %2 = tpu.matmul %0, %1, %cst {dimension_numbers = #tpu.dot_dimension_numbers<[1], [0], [0], [1], [0, 0, 1, 1], [], []>} : vector<16x896xbf16>, vector<896x512xbf16>, vector<16x512xf32> -> vector<16x512xf32>
    %c0_3 = arith.constant 0 : index
    %c0_4 = arith.constant 0 : index
    %3 = vector.load %arg3[%c0_3, %c0_4] : memref<1x512xf32, #tpu.memory_space<vmem>>, vector<1x512xf32>
    %4 = vector.broadcast %3 : vector<1x512xf32> to vector<16x512xf32>
    %5 = arith.addf %2, %4 : vector<16x512xf32>
    %cst_5 = arith.constant 2.000000e-01 : f32
    %6 = vector.broadcast %cst_5 : f32 to vector<16x512xf32>
    %7 = arith.mulf %6, %5 : vector<16x512xf32>
    %8 = arith.maximumf %5, %7 : vector<16x512xf32>
    %9 = arith.truncf %8 : vector<16x512xf32> to vector<16x512xbf16>
    %c0_6 = arith.constant 0 : index
    %c0_7 = arith.constant 0 : index
    %10 = vector.load %arg4[%c0_6, %c0_7] : memref<512x256xbf16, #tpu.memory_space<vmem>>, vector<512x256xbf16>
    %cst_8 = arith.constant dense<0.000000e+00> : vector<16x256xf32>
    %11 = tpu.matmul %9, %10, %cst_8 {dimension_numbers = #tpu.dot_dimension_numbers<[1], [0], [0], [1], [0, 0, 1, 1], [], []>} : vector<16x512xbf16>, vector<512x256xbf16>, vector<16x256xf32> -> vector<16x256xf32>
    %c0_9 = arith.constant 0 : index
    %c0_10 = arith.constant 0 : index
    %12 = vector.load %arg5[%c0_9, %c0_10] : memref<1x256xf32, #tpu.memory_space<vmem>>, vector<1x256xf32>
    %13 = vector.broadcast %12 : vector<1x256xf32> to vector<16x256xf32>
    %14 = arith.addf %11, %13 : vector<16x256xf32>
    %cst_11 = arith.constant 2.000000e-01 : f32
    %15 = vector.broadcast %cst_11 : f32 to vector<16x256xf32>
    %16 = arith.mulf %15, %14 : vector<16x256xf32>
    %17 = arith.maximumf %14, %16 : vector<16x256xf32>
    %c0_12 = arith.constant 0 : index
    %c0_13 = arith.constant 0 : index
    %18 = vector.load %arg6[%c0_12, %c0_13] : memref<1x256xf32, #tpu.memory_space<vmem>>, vector<1x256xf32>
    %19 = vector.broadcast %18 : vector<1x256xf32> to vector<16x256xf32>
    %20 = arith.mulf %17, %19 : vector<16x256xf32>
    %cst_14 = arith.constant dense<0.000000e+00> : vector<16xf32>
    %21 = vector.multi_reduction <add>, %20, %cst_14 [1] : vector<16x256xf32> to vector<16xf32>
    %22 = vector.shape_cast %21 : vector<16xf32> to vector<16x1xf32>
    %c0_15 = arith.constant 0 : index
    %c0_16 = arith.constant 0 : index
    %23 = vector.load %arg7[%c0_15, %c0_16] : memref<1x1xf32, #tpu.memory_space<vmem>>, vector<1x1xf32>
    %24 = vector.broadcast %23 : vector<1x1xf32> to vector<16x1xf32>
    %25 = arith.addf %22, %24 : vector<16x1xf32>
    %26 = arith.negf %25 : vector<16x1xf32>
    %27 = math.exp %26 : vector<16x1xf32>
    %cst_17 = arith.constant 1.000000e+00 : f32
    %28 = vector.broadcast %cst_17 : f32 to vector<16x1xf32>
    %29 = arith.addf %28, %27 : vector<16x1xf32>
    %30 = arith.divf %28, %29 : vector<16x1xf32>
    %c0_18 = arith.constant 0 : index
    %c0_19 = arith.constant 0 : index
    %31 = vector.load %arg8[%c0_18, %c0_19] : memref<16x1xf32, #tpu.memory_space<vmem>>, vector<16x1xf32>
    tpu.vector_store %arg8[%c0_18, %c0_19], %30 {strides = array<i32>} : memref<16x1xf32, #tpu.memory_space<vmem>>, vector<16x1xf32>,
    return
  }
  func.func @transform_0(%arg0: i32) -> (i32, i32) {
    %c0_i32 = arith.constant 0 : i32
    %c0_i32_0 = arith.constant 0 : i32
    return %arg0, %c0_i32 : i32, i32
  }
  func.func @transform_1(%arg0: i32) -> (i32, i32) {
    %c0_i32 = arith.constant 0 : i32
    %c0_i32_0 = arith.constant 0 : i32
    %c0_i32_1 = arith.constant 0 : i32
    return %c0_i32, %c0_i32_0 : i32, i32
  }
  func.func @transform_2(%arg0: i32) -> (i32, i32) {
    %c0_i32 = arith.constant 0 : i32
    %c0_i32_0 = arith.constant 0 : i32
    %c0_i32_1 = arith.constant 0 : i32
    return %c0_i32, %c0_i32_0 : i32, i32
  }
  func.func @transform_3(%arg0: i32) -> (i32, i32) {
    %c0_i32 = arith.constant 0 : i32
    %c0_i32_0 = arith.constant 0 : i32
    %c0_i32_1 = arith.constant 0 : i32
    return %c0_i32, %c0_i32_0 : i32, i32
  }
  func.func @transform_4(%arg0: i32) -> (i32, i32) {
    %c0_i32 = arith.constant 0 : i32
    %c0_i32_0 = arith.constant 0 : i32
    %c0_i32_1 = arith.constant 0 : i32
    return %c0_i32, %c0_i32_0 : i32, i32
  }
  func.func @transform_5(%arg0: i32) -> (i32, i32) {
    %c0_i32 = arith.constant 0 : i32
    %c0_i32_0 = arith.constant 0 : i32
    %c0_i32_1 = arith.constant 0 : i32
    return %c0_i32, %c0_i32_0 : i32, i32
  }
  func.func @transform_6(%arg0: i32) -> (i32, i32) {
    %c0_i32 = arith.constant 0 : i32
    %c0_i32_0 = arith.constant 0 : i32
    %c0_i32_1 = arith.constant 0 : i32
    return %c0_i32, %c0_i32_0 : i32, i32
  }
  func.func @transform_7(%arg0: i32) -> (i32, i32) {
    %c0_i32 = arith.constant 0 : i32
    %c0_i32_0 = arith.constant 0 : i32
    return %arg0, %c0_i32 : i32, i32
  }
}

</mosaic_0001>

<bundles_post_ra>
// kernel: discriminator_forward.1
= control target key start
LH: loop header
LB: loop body
LE: loop exit
PB: predicated region body
PF: predicated region fallthrough
CT: control target
= control target key end

     0   :  { %s4168_s0 = inlined_call_operand.vmem [shape: bf16[16,896], index: 0, kind: input, shape index: {}]   ;;  %s4169_s1 = inlined_call_operand.hbm [shape: bf16[896,512], index: 1, kind: input, shape index: {}]   ;;  %s4170_s2 = inlined_call_operand.vmem [shape: f32[1,512], index: 2, kind: input, shape index: {}]   ;;  %s4171_s3 = inlined_call_operand.hbm [shape: bf16[512,256], index: 3, kind: input, shape index: {}]   ;;  %s4172_s4 = inlined_call_operand.vmem [shape: f32[1,256], index: 4, kind: input, shape index: {}]   ;;  %s4173_s5 = inlined_call_operand.vmem [shape: f32[1,256], index: 5, kind: input, shape index: {}]   ;;  %s4174_s6 = inlined_call_operand.<no memory space> [shape: f32[1,1], index: 6, kind: input, shape index: {}]   ;;  %s4175_s7 = inlined_call_operand.vmem [shape: f32[16,1], index: 7, kind: output, shape index: {}]  }
   0x1   :  { %v12_v0 = vstv %s4174_s6 }
   0x2   :  { %13 = vst [vmem:[#allocation2] sm:$0x1] %v12_v0 }
   0x3   :  { %14 = vsyncpa [#allocation4], 0  ;;  %s22_s28 = sshll.u32 %s4169_s1, 4  ;;  %s23_s28 = int_to_ptr.hbm [resolvable:$true] %s22_s28 }
   0x4   :  { %15 = vsyncpa [#allocation6], 0  ;;  %s3993_s29 = smov [#allocation3]   ;;  %s37_s10 = sshll.u32 %s4171_s3, 4  ;;  %s38_s10 = int_to_ptr.hbm [resolvable:$true] %s37_s10 }
   0x5   :  { %s24_s30 = sshll.u32 %s3993_s29, 4  ;;  %s3994_s11 = smov 256   ;;  %s25_s30 = int_to_ptr.vmem [resolvable:$true] %s24_s30 }
   0x6   :  { %s3995_s12 = smov 16   ;;  %s3996_s6 = smov [#allocation5]  }
   0x7   :  { %30 = dma.hbm_to_vmem [thread:$0]  %s23_s28, 28672, %s25_s30, [#allocation4], %s3994_s11, %s3994_s11, %s3995_s12  }
   0x8   :  { %s39_s13 = sshll.u32 %s3996_s6, 4  ;;  %s3997_s14 = smov 128   ;;  %s40_s13 = int_to_ptr.vmem [resolvable:$true] %s39_s13 }
   0x9   :  { %s3998_s15 = smov 8  }
   0xa   :  { %45 = dma.hbm_to_vmem [thread:$0]  %s38_s10, 8192, %s40_s13, [#allocation6], %s3997_s14, %s3997_s14, %s3998_s15  }
   0xb   :  { %3989 = dma.done.wait [#allocation4], 28672  }
   0xc   :  { %3990 = vsyncadd [#allocation4], 4294938624 }
   0xd   :  { %3991 = dma.done.wait [#allocation6], 8192  }
   0xe   :  { %3992 = vsyncadd [#allocation6], 4294959104  ;;  %v2591_v1 = vld [vmem:[#allocation3 + $0xe0] sm:$0xf]  ;;  %v3668_v2 = vld [vmem:[#allocation3 + $0xec] sm:$0xf0] }
   0xf   :  { %v2719_v3 = vld [vmem:[#allocation3 + $0x1e0] sm:$0xf]  ;;  %v2592_v4 = vor.u32 %v3668_v2, %v2591_v1  ;;  %v3700_v5 = vld [vmem:[#allocation3 + $0x1ec] sm:$0xf0]  ;;  %vm2440_vm2 = vcmask 7168  }
  0x10   :  { %v2847_v6 = vld [vmem:[#allocation3 + $0x2e0] sm:$0xf]  ;;  %v3732_v7 = vld [vmem:[#allocation3 + $0x2ec] sm:$0xf0]  ;;  %v2720_v8 = vor.u32 %v3700_v5, %v2719_v3 }
  0x11   :  { %v2848_v9 = vor.u32 %v3732_v7, %v2847_v6  ;;  %v2975_v10 = vld [vmem:[#allocation3 + $0x3e0] sm:$0xf]  ;;  %v3764_v11 = vld [vmem:[#allocation3 + $0x3ec] sm:$0xf0]  ;;  %1458 = vmatpush.bf16.msra.mxu0 %v2592_v4 }
  0x12   :  { %v2575_v12 = vld [vmem:[#allocation3 + $0xc0] sm:$0xf]  ;;  %v2976_v13 = vor.u32 %v3764_v11, %v2975_v10  ;;  %v3664_v14 = vld [vmem:[#allocation3 + $0xcc] sm:$0xf0]  ;;  %1472 = vmatpush.bf16.msra.mxu1 %v2720_v8 }
  0x13   :  { %v2703_v15 = vld [vmem:[#allocation3 + $0x1c0] sm:$0xf]  ;;  %v3696_v16 = vld [vmem:[#allocation3 + $0x1cc] sm:$0xf0]  ;;  %1486 = vmatpush.bf16.msra.mxu2 %v2848_v9  ;;  %v2576_v17 = vor.u32 %v3664_v14, %v2575_v12 }
  0x14   :  { %v2704_v18 = vor.u32 %v3696_v16, %v2703_v15  ;;  %v2831_v19 = vld [vmem:[#allocation3 + $0x2c0] sm:$0xf]  ;;  %v3728_v20 = vld [vmem:[#allocation3 + $0x2cc] sm:$0xf0]  ;;  %1500 = vmatpush.bf16.msra.mxu3 %v2976_v13 }
  0x15   :  { %v2959_v21 = vld [vmem:[#allocation3 + $0x3c0] sm:$0xf]  ;;  %v2832_v22 = vor.u32 %v3728_v20, %v2831_v19  ;;  %v3760_v23 = vld [vmem:[#allocation3 + $0x3cc] sm:$0xf0]  ;;  %1459 = vmatpush.bf16.msra.mxu0 %v2576_v17 }
  0x16   :  { %v2559_v24 = vld [vmem:[#allocation3 + $0xa0] sm:$0xf]  ;;  %v3660_v25 = vld [vmem:[#allocation3 + $0xac] sm:$0xf0]  ;;  %v2960_v26 = vor.u32 %v3760_v23, %v2959_v21  ;;  %1473 = vmatpush.bf16.msra.mxu1 %v2704_v18 }
  0x17   :  { %v2687_v27 = vld [vmem:[#allocation3 + $0x1a0] sm:$0xf]  ;;  %v3692_v28 = vld [vmem:[#allocation3 + $0x1ac] sm:$0xf0]  ;;  %v2560_v30 = vor.u32 %v3660_v25, %v2559_v24  ;;  %1487 = vmatpush.bf16.msra.mxu2 %v2832_v22 }
  0x18   :  { %v2815_v29 = vld [vmem:[#allocation3 + $0x2a0] sm:$0xf]  ;;  %v3724_v31 = vld [vmem:[#allocation3 + $0x2ac] sm:$0xf0]  ;;  %v2688_v34 = vor.u32 %v3692_v28, %v2687_v27  ;;  %1501 = vmatpush.bf16.msra.mxu3 %v2960_v26 }
  0x19   :  { %v2943_v32 = vld [vmem:[#allocation3 + $0x3a0] sm:$0xf]  ;;  %v3756_v33 = vld [vmem:[#allocation3 + $0x3ac] sm:$0xf0]  ;;  %v2816_v35 = vor.u32 %v3724_v31, %v2815_v29  ;;  %1460 = vmatpush.bf16.msra.mxu0 %v2560_v30 }
  0x1a   :  { %v2543_v36 = vld [vmem:[#allocation3 + $0x80] sm:$0xf]  ;;  %v3656_v37 = vld [vmem:[#allocation3 + $0x8c] sm:$0xf0]  ;;  %v2944_v39 = vor.u32 %v3756_v33, %v2943_v32  ;;  %1474 = vmatpush.bf16.msra.mxu1 %v2688_v34 }
  0x1b   :  { %v2671_v38 = vld [vmem:[#allocation3 + $0x180] sm:$0xf]  ;;  %v3688_v40 = vld [vmem:[#allocation3 + $0x18c] sm:$0xf0]  ;;  %v2544_v45 = vor.u32 %v3656_v37, %v2543_v36  ;;  %1488 = vmatpush.bf16.msra.mxu2 %v2816_v35 }
  0x1c   :  { %v2799_v41 = vld [vmem:[#allocation3 + $0x280] sm:$0xf]  ;;  %v3720_v42 = vld [vmem:[#allocation3 + $0x28c] sm:$0xf0]  ;;  %v2672_v46 = vor.u32 %v3688_v40, %v2671_v38  ;;  %1502 = vmatpush.bf16.msra.mxu3 %v2944_v39  ;;  %v3666_v38 = vld [vmem:[#allocation3 + $0xe4] sm:$0xf] }
  0x1d   :  { %v2927_v43 = vld [vmem:[#allocation3 + $0x380] sm:$0xf]  ;;  %v3752_v44 = vld [vmem:[#allocation3 + $0x38c] sm:$0xf0]  ;;  %v2800_v47 = vor.u32 %v3720_v42, %v2799_v41  ;;  %1461 = vmatpush.bf16.msra.mxu0 %v2544_v45  ;;  %v2593_v39 = vld [vmem:[#allocation3 + $0xf0] sm:$0xf0] }
  0x1e   :  { %v2527_v48 = vld [vmem:[#allocation3 + $0x60] sm:$0xf]  ;;  %v3652_v49 = vld [vmem:[#allocation3 + $0x6c] sm:$0xf0]  ;;  %v2928_v51 = vor.u32 %v3752_v44, %v2927_v43  ;;  %1475 = vmatpush.bf16.msra.mxu1 %v2672_v46 }
  0x1f   :  { %v2655_v50 = vld [vmem:[#allocation3 + $0x160] sm:$0xf]  ;;  %v3684_v52 = vld [vmem:[#allocation3 + $0x16c] sm:$0xf0]  ;;  %v2528_v57 = vor.u32 %v3652_v49, %v2527_v48  ;;  %1489 = vmatpush.bf16.msra.mxu2 %v2800_v47  ;;  %v2596_v49 = vor.u32 %v3666_v38, %v2593_v39 }
  0x20   :  { %v2783_v53 = vld [vmem:[#allocation3 + $0x260] sm:$0xf]  ;;  %v3716_v54 = vld [vmem:[#allocation3 + $0x26c] sm:$0xf0]  ;;  %v2656_v58 = vor.u32 %v3684_v52, %v2655_v50  ;;  %1503 = vmatpush.bf16.msra.mxu3 %v2928_v51  ;;  %v3662_v51 = vld [vmem:[#allocation3 + $0xc4] sm:$0xf] }
  0x21   :  { %v2911_v55 = vld [vmem:[#allocation3 + $0x360] sm:$0xf]  ;;  %v3748_v56 = vld [vmem:[#allocation3 + $0x36c] sm:$0xf0]  ;;  %v2784_v59 = vor.u32 %v3716_v54, %v2783_v53  ;;  %1462 = vmatpush.bf16.msra.mxu0 %v2528_v57  ;;  %v2577_v52 = vld [vmem:[#allocation3 + $0xd0] sm:$0xf0] }
  0x22   :  { %v2511_v60 = vld [vmem:[#allocation3 + $0x40] sm:$0xf]  ;;  %v3648_v61 = vld [vmem:[#allocation3 + $0x4c] sm:$0xf0]  ;;  %v2912_v63 = vor.u32 %v3748_v56, %v2911_v55  ;;  %1476 = vmatpush.bf16.msra.mxu1 %v2656_v58  ;;  %v3634_v54 = vld [vmem:[%s4168_s0 + $0x18] sm:$0xf0] }
  0x23   :  { %v2639_v62 = vld [vmem:[#allocation3 + $0x140] sm:$0xf]  ;;  %v3680_v0 = vld [vmem:[#allocation3 + $0x14c] sm:$0xf0]  ;;  %v2512_v5 = vor.u32 %v3648_v61, %v2511_v60  ;;  %1490 = vmatpush.bf16.msra.mxu2 %v2784_v59  ;;  %v2459_v55 = vld [vmem:[%s4168_s0 + $0x8] sm:$0xf] }
  0x24   :  { %v2767_v1 = vld [vmem:[#allocation3 + $0x240] sm:$0xf]  ;;  %v3712_v2 = vld [vmem:[#allocation3 + $0x24c] sm:$0xf0]  ;;  %v2640_v6 = vor.u32 %v3680_v0, %v2639_v62  ;;  %1504 = vmatpush.bf16.msra.mxu3 %v2912_v63 }
  0x25   :  { %v2895_v3 = vld [vmem:[#allocation3 + $0x340] sm:$0xf]  ;;  %v3744_v4 = vld [vmem:[#allocation3 + $0x34c] sm:$0xf0]  ;;  %v2768_v7 = vor.u32 %v3712_v2, %v2767_v1  ;;  %1463 = vmatpush.bf16.msra.mxu0 %v2512_v5  ;;  %v2580_v2 = vor.u32 %v3662_v51, %v2577_v52  ;;  %v3658_v5 = vld [vmem:[#allocation3 + $0xa4] sm:$0xf] }
  0x26   :  { %v2495_v8 = vld [vmem:[#allocation3 + $0x20] sm:$0xf]  ;;  %v3644_v9 = vld [vmem:[#allocation3 + $0x2c] sm:$0xf0]  ;;  %v2896_v11 = vor.u32 %v3744_v4, %v2895_v3  ;;  %1477 = vmatpush.bf16.msra.mxu1 %v2640_v6  ;;  %v2561_v6 = vld [vmem:[#allocation3 + $0xb0] sm:$0xf0] }
  0x27   :  { %v2623_v10 = vld [vmem:[#allocation3 + $0x120] sm:$0xf]  ;;  %v3676_v12 = vld [vmem:[#allocation3 + $0x12c] sm:$0xf0]  ;;  %v2496_v17 = vor.u32 %v3644_v9, %v2495_v8  ;;  %1491 = vmatpush.bf16.msra.mxu2 %v2768_v7 }
  0x28   :  { %v2751_v13 = vld [vmem:[#allocation3 + $0x220] sm:$0xf]  ;;  %v3708_v14 = vld [vmem:[#allocation3 + $0x22c] sm:$0xf0]  ;;  %v2624_v20 = vor.u32 %v3676_v12, %v2623_v10  ;;  %1505 = vmatpush.bf16.msra.mxu3 %v2896_v11 }
  0x29   :  { %v2879_v15 = vld [vmem:[#allocation3 + $0x320] sm:$0xf]  ;;  %v3740_v16 = vld [vmem:[#allocation3 + $0x32c] sm:$0xf0]  ;;  %v2752_v21 = vor.u32 %v3708_v14, %v2751_v13  ;;  %1464 = vmatpush.bf16.msra.mxu0 %v2496_v17 }
  0x2a   :  { %v2479_v18 = vld [vmem:[#allocation3] sm:$0xf]  ;;  %v3640_v19 = vld [vmem:[#allocation3 + $0xc] sm:$0xf0]  ;;  %v2880_v25 = vor.u32 %v3740_v16, %v2879_v15  ;;  %1478 = vmatpush.bf16.msra.mxu1 %v2624_v20  ;;  %v3632_v20 = vld [vmem:[%s4168_s0 + $0xc] sm:$0xf] }
  0x2b   :  { %v2607_v22 = vld [vmem:[#allocation3 + $0x100] sm:$0xf]  ;;  %v3672_v23 = vld [vmem:[#allocation3 + $0x10c] sm:$0xf0]  ;;  %v2480_v32 = vor.u32 %v3640_v19, %v2479_v18  ;;  %1492 = vmatpush.bf16.msra.mxu2 %v2752_v21  ;;  %v2564_v18 = vor.u32 %v3658_v5, %v2561_v6  ;;  %v2461_v21 = vld [vmem:[%s4168_s0 + $0x24] sm:$0xf0] }
  0x2c   :  { %v2735_v24 = vld [vmem:[#allocation3 + $0x200] sm:$0xf]  ;;  %v3704_v26 = vld [vmem:[#allocation3 + $0x20c] sm:$0xf0]  ;;  %v2608_v36 = vor.u32 %v3672_v23, %v2607_v22  ;;  %1506 = vmatpush.bf16.msra.mxu3 %v2880_v25  ;;  %v3654_v22 = vld [vmem:[#allocation3 + $0x84] sm:$0xf] }
  0x2d   :  { %v2863_v27 = vld [vmem:[#allocation3 + $0x300] sm:$0xf]  ;;  %v3736_v28 = vld [vmem:[#allocation3 + $0x30c] sm:$0xf0]  ;;  %v2736_v37 = vor.u32 %v3704_v26, %v2735_v24  ;;  %1465 = vmatpush.bf16.msra.mxu0 %v2480_v32  ;;  %v2545_v23 = vld [vmem:[#allocation3 + $0x90] sm:$0xf0]  ;;  %v4081_v24 = vor.u32 %v3632_v20, %v2461_v21 }
  0x2e   :  { %v3103_v29 = vld [vmem:[#allocation3 + $0x4e0] sm:$0xf]  ;;  %v3796_v30 = vld [vmem:[#allocation3 + $0x4ec] sm:$0xf0]  ;;  %v2864_v40 = vor.u32 %v3736_v28, %v2863_v27  ;;  %1479 = vmatpush.bf16.msra.mxu1 %v2608_v36  ;;  %v2529_v36 = vld [vmem:[#allocation3 + $0x70] sm:$0xf0] }
  0x2f   :  { %v3231_v31 = vld [vmem:[#allocation3 + $0x5e0] sm:$0xf]  ;;  %v3828_v33 = vld [vmem:[#allocation3 + $0x5ec] sm:$0xf0]  ;;  %v3104_v41 = vor.u32 %v3796_v30, %v3103_v29  ;;  %1493 = vmatpush.bf16.msra.mxu2 %v2736_v37  ;;  %v3105_v20 = vld [vmem:[#allocation3 + $0x4f0] sm:$0xf0] }
  0x30   :  { %v3359_v34 = vld [vmem:[#allocation3 + $0x6e0] sm:$0xf]  ;;  %v3860_v35 = vld [vmem:[#allocation3 + $0x6ec] sm:$0xf0]  ;;  %v3232_v44 = vor.u32 %v3828_v33, %v3231_v31  ;;  %1507 = vmatpush.bf16.msra.mxu3 %v2864_v40  ;;  %v2548_v31 = vor.u32 %v3654_v22, %v2545_v23 }
  0x31   :  { %v3087_v42 = vld [vmem:[#allocation3 + $0x4c0] sm:$0xf]  ;;  %v3792_v43 = vld [vmem:[#allocation3 + $0x4cc] sm:$0xf0]  ;;  %v3360_v45 = vor.u32 %v3860_v35, %v3359_v34  ;;  %1514 = vmatpush.bf16.msrb.mxu0 %v3104_v41  ;;  %v3650_v35 = vld [vmem:[#allocation3 + $0x64] sm:$0xf] }
  0x32   :  { %v3215_v46 = vld [vmem:[#allocation3 + $0x5c0] sm:$0xf]  ;;  %v3824_v47 = vld [vmem:[#allocation3 + $0x5cc] sm:$0xf0]  ;;  %v3088_v56 = vor.u32 %v3792_v43, %v3087_v42  ;;  %1528 = vmatpush.bf16.msrb.mxu1 %v3232_v44  ;;  %v2532_v43 = vor.u32 %v3650_v35, %v2529_v36  ;;  %v2705_v35 = vld [vmem:[#allocation3 + $0x1d0] sm:$0xf0] }
  0x33   :  { %v3343_v48 = vld [vmem:[#allocation3 + $0x6c0] sm:$0xf]  ;;  %v3856_v50 = vld [vmem:[#allocation3 + $0x6cc] sm:$0xf0]  ;;  %1542 = vmatpush.bf16.msrb.mxu2 %v3360_v45  ;;  %v3216_v60 = vor.u32 %v3824_v47, %v3215_v46  ;;  %1508 = vmatmul.bf16.vlgmr.msra.gmra.mxu3 %v4081_v24  ;;  %v3646_v47 = vld [vmem:[#allocation3 + $0x44] sm:$0xf] }
  0x34   :  { %v2451_v53 = vld [vmem:[%s4168_s0] sm:$0xf]  ;;  %v3635_v59 = vld [vmem:[%s4168_s0 + $0x20] sm:$0xf0]  ;;  %v3344_v61 = vor.u32 %v3856_v50, %v3343_v48  ;;  %v3788_v62 = vld [vmem:[#allocation3 + $0x4ac] sm:$0xf0]  ;;  %1556 = vmatpush.bf16.msrb.mxu3 %v2596_v49 }
  0x35   :  { %v3071_v57 = vld [vmem:[#allocation3 + $0x4a0] sm:$0xf]  ;;  %v4057_v58 = vor.u32 %v3634_v54, %v2451_v53  ;;  %v3820_v0 = vld [vmem:[#allocation3 + $0x5ac] sm:$0xf0]  ;;  %v4062_v1 = vor.u32 %v3635_v59, %v2459_v55  ;;  %1515 = vmatpush.bf16.msrb.mxu0 %v3088_v56  ;;  %v2513_v48 = vld [vmem:[#allocation3 + $0x50] sm:$0xf0] }
  0x36   :  { %v3199_v63 = vld [vmem:[#allocation3 + $0x5a0] sm:$0xf]  ;;  %v3852_v4 = vld [vmem:[#allocation3 + $0x6ac] sm:$0xf0]  ;;  %v3072_v9 = vor.u32 %v3788_v62, %v3071_v57  ;;  %1529 = vmatpush.bf16.msrb.mxu1 %v3216_v60  ;;  %v2516_v55 = vor.u32 %v3646_v47, %v2513_v48  ;;  %v3642_v60 = vld [vmem:[#allocation3 + $0x24] sm:$0xf] }
  0x37   :  { %v3327_v3 = vld [vmem:[#allocation3 + $0x6a0] sm:$0xf]  ;;  %1466 = vmatmul.bf16.vlgmr.msra.gmra.mxu0 %v4057_v58  ;;  %1494 = vmatmul.bf16.vlgmr.msra.gmra.mxu2 %v4062_v1  ;;  %v3784_v11 = vld [vmem:[#allocation3 + $0x48c] sm:$0xf0]  ;;  %v3200_v13 = vor.u32 %v3820_v0, %v3199_v63  ;;  %v3726_v36 = vld [vmem:[#allocation3 + $0x2c4] sm:$0xf] }
  0x38   :  { %v3631_v7 = vld [vmem:[%s4168_s0 + $0x4] sm:$0xf]  ;;  %v2453_v8 = vld [vmem:[%s4168_s0 + $0x1c] sm:$0xf0]  ;;  %1543 = vmatpush.bf16.msrb.mxu2 %v3344_v61  ;;  %v3328_v14 = vor.u32 %v3852_v4, %v3327_v3  ;;  %v3816_v16 = vld [vmem:[#allocation3 + $0x58c] sm:$0xf0]  ;;  %1557 = vmatpush.bf16.msrb.mxu3 %v2580_v2 }
  0x39   :  { %v3055_v10 = vld [vmem:[#allocation3 + $0x480] sm:$0xf]  ;;  %v4072_v12 = vor.u32 %v3631_v7, %v2453_v8  ;;  %v3848_v19 = vld [vmem:[#allocation3 + $0x68c] sm:$0xf0]  ;;  %1516 = vmatpush.bf16.msrb.mxu0 %v3072_v9  ;;  %v2497_v61 = vld [vmem:[#allocation3 + $0x30] sm:$0xf0] }
  0x3a   :  { %v3183_v15 = vld [vmem:[#allocation3 + $0x580] sm:$0xf]  ;;  %v3056_v25 = vor.u32 %v3784_v11, %v3055_v10  ;;  %1530 = vmatpush.bf16.msrb.mxu1 %v3200_v13  ;;  %v3780_v29 = vld [vmem:[#allocation3 + $0x46c] sm:$0xf0]  ;;  %v3638_v8 = vld [vmem:[#allocation3 + $0x4] sm:$0xf]  ;;  %v2500_v9 = vor.u32 %v3642_v60, %v2497_v61 }
  0x3b   :  { %v3311_v17 = vld [vmem:[#allocation3 + $0x680] sm:$0xf]  ;;  %1480 = vmatmul.bf16.vlgmr.msra.gmra.mxu1 %v4072_v12  ;;  %v3184_v26 = vor.u32 %v3816_v16, %v3183_v15  ;;  %v3812_v32 = vld [vmem:[#allocation3 + $0x56c] sm:$0xf0]  ;;  %v2481_v10 = vld [vmem:[#allocation3 + $0x10] sm:$0xf0] }
  0x3c   :  { %1544 = vmatpush.bf16.msrb.mxu2 %v3328_v14  ;;  %v3312_v27 = vor.u32 %v3848_v19, %v3311_v17  ;;  %v3039_v28 = vld [vmem:[#allocation3 + $0x460] sm:$0xf]  ;;  %1558 = vmatpush.bf16.msrb.mxu3 %v2564_v18  ;;  %v3844_v34 = vld [vmem:[#allocation3 + $0x66c] sm:$0xf0]  ;;  %v3698_v11 = vld [vmem:[#allocation3 + $0x1e4] sm:$0xf] }
  0x3d   :  { %v3167_v30 = vld [vmem:[#allocation3 + $0x560] sm:$0xf]  ;;  %1517 = vmatpush.bf16.msrb.mxu0 %v3056_v25  ;;  %v3040_v37 = vor.u32 %v3780_v29, %v3039_v28  ;;  %v3776_v41 = vld [vmem:[#allocation3 + $0x44c] sm:$0xf0]  ;;  %v2721_v13 = vld [vmem:[#allocation3 + $0x1f0] sm:$0xf0] }
  0x3e   :  { %v3295_v33 = vld [vmem:[#allocation3 + $0x660] sm:$0xf]  ;;  %1531 = vmatpush.bf16.msrb.mxu1 %v3184_v26  ;;  %v3168_v38 = vor.u32 %v3812_v32, %v3167_v30  ;;  %v3808_v44 = vld [vmem:[#allocation3 + $0x54c] sm:$0xf0]  ;;  %v3730_v14 = vld [vmem:[#allocation3 + $0x2e4] sm:$0xf]  ;;  %v2724_v28 = vor.u32 %v3698_v11, %v2721_v13 }
  0x3f   :  { %v3296_v39 = vor.u32 %v3844_v34, %v3295_v33  ;;  %v3023_v40 = vld [vmem:[#allocation3 + $0x440] sm:$0xf]  ;;  %v3840_v46 = vld [vmem:[#allocation3 + $0x64c] sm:$0xf0]  ;;  %v2849_v15 = vld [vmem:[#allocation3 + $0x2f0] sm:$0xf0] }
  0x40   :  { %1545 = vmatpush.bf16.msrb.mxu2 %v3312_v27  ;;  %v3151_v42 = vld [vmem:[#allocation3 + $0x540] sm:$0xf]  ;;  %1559 = vmatpush.bf16.msrb.mxu3 %v2548_v31  ;;  %v3024_v49 = vor.u32 %v3776_v41, %v3023_v40  ;;  %v3772_v53 = vld [vmem:[#allocation3 + $0x42c] sm:$0xf0]  ;;  %v3762_v16 = vld [vmem:[#allocation3 + $0x3e4] sm:$0xf]  ;;  %v2484_v27 = vor.u32 %v3638_v8, %v2481_v10  ;;  %v2852_v32 = vor.u32 %v3730_v14, %v2849_v15 }
  0x41   :  { %v3279_v45 = vld [vmem:[#allocation3 + $0x640] sm:$0xf]  ;;  %1518 = vmatpush.bf16.msrb.mxu0 %v3040_v37  ;;  %v3152_v50 = vor.u32 %v3808_v44, %v3151_v42  ;;  %v3804_v56 = vld [vmem:[#allocation3 + $0x52c] sm:$0xf0]  ;;  %v2977_v18 = vld [vmem:[#allocation3 + $0x3f0] sm:$0xf0] }
  0x42   :  { %1532 = vmatpush.bf16.msrb.mxu1 %v3168_v38  ;;  %v3280_v51 = vor.u32 %v3840_v46, %v3279_v45  ;;  %v3007_v52 = vld [vmem:[#allocation3 + $0x420] sm:$0xf]  ;;  %v3836_v59 = vld [vmem:[#allocation3 + $0x62c] sm:$0xf0]  ;;  %v3794_v19 = vld [vmem:[#allocation3 + $0x4e4] sm:$0xf]  ;;  %v2980_v33 = vor.u32 %v3762_v16, %v2977_v18 }
  0x43   :  { %v3135_v54 = vld [vmem:[#allocation3 + $0x520] sm:$0xf]  ;;  %v3008_v63 = vor.u32 %v3772_v53, %v3007_v52  ;;  %v3768_v0 = vld [vmem:[#allocation3 + $0x40c] sm:$0xf0]  ;;  %v3636_v25 = vld [vmem:[%s4168_s0 + $0x28] sm:$0xf0]  ;;  %v3108_v37 = vor.u32 %v3794_v19, %v3105_v20 }
  0x44   :  { %1546 = vmatpush.bf16.msrb.mxu2 %v3296_v39  ;;  %1560 = vmatpush.bf16.msrb.mxu3 %v2532_v43  ;;  %v3263_v57 = vld [vmem:[#allocation3 + $0x620] sm:$0xf]  ;;  %v3800_v3 = vld [vmem:[#allocation3 + $0x50c] sm:$0xf0]  ;;  %v3136_v4 = vor.u32 %v3804_v56, %v3135_v54  ;;  %v2475_v26 = vld [vmem:[%s4168_s0 + $0x18] sm:$0xf] }
  0x45   :  { %v2991_v62 = vld [vmem:[#allocation3 + $0x400] sm:$0xf]  ;;  %1519 = vmatpush.bf16.msrb.mxu0 %v3024_v49  ;;  %v3264_v5 = vor.u32 %v3836_v59, %v3263_v57  ;;  %v3832_v7 = vld [vmem:[#allocation3 + $0x60c] sm:$0xf0]  ;;  %v3694_v34 = vld [vmem:[#allocation3 + $0x1c4] sm:$0xf] }
  0x46   :  { %v3119_v2 = vld [vmem:[#allocation3 + $0x500] sm:$0xf]  ;;  %1533 = vmatpush.bf16.msrb.mxu1 %v3152_v50  ;;  %v2992_v17 = vor.u32 %v3768_v0, %v2991_v62  ;;  %v2467_v23 = vld [vmem:[%s4168_s0 + $0x10] sm:$0xf]  ;;  %v3637_v29 = vld [vmem:[%s4168_s0 + $0x30] sm:$0xf0]  ;;  %v2708_v46 = vor.u32 %v3694_v34, %v2705_v35 }
  0x47   :  { %v3247_v6 = vld [vmem:[#allocation3 + $0x600] sm:$0xf]  ;;  %v3120_v21 = vor.u32 %v3800_v3, %v3119_v2  ;;  %v3633_v30 = vld [vmem:[%s4168_s0 + $0x14] sm:$0xf]  ;;  %v2469_v31 = vld [vmem:[%s4168_s0 + $0x2c] sm:$0xf0]  ;;  %v4102_v38 = vor.u32 %v3636_v25, %v2467_v23  ;;  %v4104_v42 = vor.u32 %v3637_v29, %v2475_v26 }
  0x48   :  { %1547 = vmatpush.bf16.msrb.mxu2 %v3280_v51  ;;  %1561 = vmatpush.bf16.msrb.mxu3 %v2516_v55  ;;  %v3248_v22 = vor.u32 %v3832_v7, %v3247_v6  ;;  %v2833_v39 = vld [vmem:[#allocation3 + $0x2d0] sm:$0xf0]  ;;  %v3758_v40 = vld [vmem:[#allocation3 + $0x3c4] sm:$0xf]  ;;  %v4106_v43 = vor.u32 %v3633_v30, %v2469_v31 }
  0x49   :  { %1520 = vmatpush.bf16.msrb.mxu0 %v3008_v63  ;;  %v2961_v41 = vld [vmem:[#allocation3 + $0x3d0] sm:$0xf0]  ;;  %v3790_v44 = vld [vmem:[#allocation3 + $0x4c4] sm:$0xf]  ;;  %v2836_v47 = vor.u32 %v3726_v36, %v2833_v39 }
  0x4a   :  { %1534 = vmatpush.bf16.msrb.mxu1 %v3136_v4  ;;  %v3089_v45 = vld [vmem:[#allocation3 + $0x4d0] sm:$0xf0]  ;;  %v2964_v48 = vor.u32 %v3758_v40, %v2961_v41  ;;  %v3690_v49 = vld [vmem:[#allocation3 + $0x1a4] sm:$0xf] }
  0x4b   :  { %v2689_v50 = vld [vmem:[#allocation3 + $0x1b0] sm:$0xf0]  ;;  %v3722_v51 = vld [vmem:[#allocation3 + $0x2a4] sm:$0xf]  ;;  %v3092_v52 = vor.u32 %v3790_v44, %v3089_v45 }
  0x4c   :  { %1548 = vmatpush.bf16.msrb.mxu2 %v3264_v5  ;;  %1562 = vmatpush.bf16.msrb.mxu3 %v2500_v9  ;;  %v2817_v53 = vld [vmem:[#allocation3 + $0x2b0] sm:$0xf0]  ;;  %v3754_v54 = vld [vmem:[#allocation3 + $0x3a4] sm:$0xf]  ;;  %v2692_v59 = vor.u32 %v3690_v49, %v2689_v50 }
  0x4d   :  { %1521 = vmatpush.bf16.msrb.mxu0 %v2992_v17  ;;  %v2945_v55 = vld [vmem:[#allocation3 + $0x3b0] sm:$0xf0]  ;;  %v3786_v56 = vld [vmem:[#allocation3 + $0x4a4] sm:$0xf]  ;;  %v2820_v60 = vor.u32 %v3722_v51, %v2817_v53 }
  0x4e   :  { %1535 = vmatpush.bf16.msrb.mxu1 %v3120_v21  ;;  %v3073_v57 = vld [vmem:[#allocation3 + $0x4b0] sm:$0xf0]  ;;  %v2948_v61 = vor.u32 %v3754_v54, %v2945_v55  ;;  %v3686_v62 = vld [vmem:[#allocation3 + $0x184] sm:$0xf] }
  0x4f   :  { %v2673_v63 = vld [vmem:[#allocation3 + $0x190] sm:$0xf0]  ;;  %v3718_v0 = vld [vmem:[#allocation3 + $0x284] sm:$0xf]  ;;  %v3076_v2 = vor.u32 %v3786_v56, %v3073_v57 }
  0x50   :  { %1549 = vmatpush.bf16.msrb.mxu2 %v3248_v22  ;;  %1563 = vmatpush.bf16.msrb.mxu3 %v2484_v27  ;;  %v2801_v3 = vld [vmem:[#allocation3 + $0x290] sm:$0xf0]  ;;  %v3750_v4 = vld [vmem:[#allocation3 + $0x384] sm:$0xf]  ;;  %v2676_v8 = vor.u32 %v3686_v62, %v2673_v63 }
  0x51   :  { %1570 = vmatpush.bf16.msra.mxu0 %v2724_v28  ;;  %1536 = vmatmul.bf16.vlgmr.msrb.gmra.mxu1 %v4106_v43  ;;  %v2929_v5 = vld [vmem:[#allocation3 + $0x390] sm:$0xf0]  ;;  %v3782_v6 = vld [vmem:[#allocation3 + $0x484] sm:$0xf]  ;;  %v2804_v9 = vor.u32 %v3718_v0, %v2801_v3 }
  0x52   :  { %1584 = vmatpush.bf16.msra.mxu1 %v2852_v32  ;;  %1522 = vmatmul.bf16.vlgmr.msrb.gmra.mxu0 %v4102_v38  ;;  %v3057_v7 = vld [vmem:[#allocation3 + $0x490] sm:$0xf0]  ;;  %v2932_v10 = vor.u32 %v3750_v4, %v2929_v5  ;;  %v3682_v11 = vld [vmem:[#allocation3 + $0x164] sm:$0xf]  ;;  %v2599_v4 = vld [vmem:[#allocation3 + $0xe8] sm:$0xf] }
  0x53   :  { %1550 = vmatmul.bf16.vlgmr.msrb.gmra.mxu2 %v4104_v42  ;;  %1564 = vmatmul.bf16.vlgmr.msrb.gmra.mxu3 %v4057_v58  ;;  %v2657_v13 = vld [vmem:[#allocation3 + $0x170] sm:$0xf0]  ;;  %v3714_v14 = vld [vmem:[#allocation3 + $0x264] sm:$0xf]  ;;  %v3060_v15 = vor.u32 %v3782_v6, %v3057_v7  ;;  %v3669_v5 = vld [vmem:[#allocation3 + $0xf4] sm:$0xf0] }
  0x54   :  { %1598 = vmatpush.bf16.msra.mxu2 %v2980_v33  ;;  %1612 = vmatpush.bf16.msra.mxu3 %v3108_v37  ;;  %v2785_v16 = vld [vmem:[#allocation3 + $0x270] sm:$0xf0]  ;;  %v3746_v17 = vld [vmem:[#allocation3 + $0x364] sm:$0xf]  ;;  %v2660_v21 = vor.u32 %v3682_v11, %v2657_v13 }
  0x55   :  { %1571 = vmatpush.bf16.msra.mxu0 %v2708_v46  ;;  %v2913_v18 = vld [vmem:[#allocation3 + $0x370] sm:$0xf0]  ;;  %v3778_v19 = vld [vmem:[#allocation3 + $0x464] sm:$0xf]  ;;  %v2788_v22 = vor.u32 %v3714_v14, %v2785_v16  ;;  %v2600_v14 = vor.u32 %v3669_v5, %v2599_v4 }
  0x56   :  { %1585 = vmatpush.bf16.msra.mxu1 %v2836_v47  ;;  %v3041_v20 = vld [vmem:[#allocation3 + $0x470] sm:$0xf0]  ;;  %v2916_v23 = vor.u32 %v3746_v17, %v2913_v18  ;;  %v3678_v25 = vld [vmem:[#allocation3 + $0x144] sm:$0xf] }
  0x57   :  { %v2641_v26 = vld [vmem:[#allocation3 + $0x150] sm:$0xf0]  ;;  %v3710_v27 = vld [vmem:[#allocation3 + $0x244] sm:$0xf]  ;;  %v3044_v28 = vor.u32 %v3778_v19, %v3041_v20  ;;  %v2583_v20 = vld [vmem:[#allocation3 + $0xc8] sm:$0xf] }
  0x58   :  { %1599 = vmatpush.bf16.msra.mxu2 %v2964_v48  ;;  %1613 = vmatpush.bf16.msra.mxu3 %v3092_v52  ;;  %v2769_v29 = vld [vmem:[#allocation3 + $0x250] sm:$0xf0]  ;;  %v3742_v30 = vld [vmem:[#allocation3 + $0x344] sm:$0xf]  ;;  %v2644_v34 = vor.u32 %v3678_v25, %v2641_v26 }
  0x59   :  { %1572 = vmatpush.bf16.msra.mxu0 %v2692_v59  ;;  %v2897_v31 = vld [vmem:[#allocation3 + $0x350] sm:$0xf0]  ;;  %v3774_v32 = vld [vmem:[#allocation3 + $0x444] sm:$0xf]  ;;  %v2772_v35 = vor.u32 %v3710_v27, %v2769_v29 }
  0x5a   :  { %1586 = vmatpush.bf16.msra.mxu1 %v2820_v60  ;;  %v3025_v33 = vld [vmem:[#allocation3 + $0x450] sm:$0xf0]  ;;  %v2900_v36 = vor.u32 %v3742_v30, %v2897_v31  ;;  %v3674_v37 = vld [vmem:[#allocation3 + $0x124] sm:$0xf] }
  0x5b   :  { %v2625_v39 = vld [vmem:[#allocation3 + $0x130] sm:$0xf0]  ;;  %v3706_v40 = vld [vmem:[#allocation3 + $0x224] sm:$0xf]  ;;  %v3028_v41 = vor.u32 %v3774_v32, %v3025_v33  ;;  %v2567_v33 = vld [vmem:[#allocation3 + $0xa8] sm:$0xf] }
  0x5c   :  { %1600 = vmatpush.bf16.msra.mxu2 %v2948_v61  ;;  %1614 = vmatpush.bf16.msra.mxu3 %v3076_v2  ;;  %v2753_v44 = vld [vmem:[#allocation3 + $0x230] sm:$0xf0]  ;;  %v3738_v45 = vld [vmem:[#allocation3 + $0x324] sm:$0xf]  ;;  %v2628_v49 = vor.u32 %v3674_v37, %v2625_v39 }
  0x5d   :  { %1573 = vmatpush.bf16.msra.mxu0 %v2676_v8  ;;  %v2881_v46 = vld [vmem:[#allocation3 + $0x330] sm:$0xf0]  ;;  %v3770_v47 = vld [vmem:[#allocation3 + $0x424] sm:$0xf]  ;;  %v2756_v52 = vor.u32 %v3706_v40, %v2753_v44  ;;  %v2727_v8 = vld [vmem:[#allocation3 + $0x1e8] sm:$0xf] }
  0x5e   :  { %1587 = vmatpush.bf16.msra.mxu1 %v2804_v9  ;;  %v3009_v48 = vld [vmem:[#allocation3 + $0x430] sm:$0xf0]  ;;  %v3670_v50 = vld [vmem:[#allocation3 + $0x104] sm:$0xf]  ;;  %v2884_v53 = vor.u32 %v3738_v45, %v2881_v46  ;;  %v3701_v9 = vld [vmem:[#allocation3 + $0x1f4] sm:$0xf0] }
  0x5f   :  { %v2609_v51 = vld [vmem:[#allocation3 + $0x110] sm:$0xf0]  ;;  %v3702_v54 = vld [vmem:[#allocation3 + $0x204] sm:$0xf]  ;;  %v3012_v57 = vor.u32 %v3770_v47, %v3009_v48  ;;  %v2728_v18 = vor.u32 %v3701_v9, %v2727_v8  ;;  %v2551_v48 = vld [vmem:[#allocation3 + $0x88] sm:$0xf] }
  0x60   :  { %1601 = vmatpush.bf16.msra.mxu2 %v2932_v10  ;;  %1615 = vmatpush.bf16.msra.mxu3 %v3060_v15  ;;  %v2737_v55 = vld [vmem:[#allocation3 + $0x210] sm:$0xf0]  ;;  %v3734_v56 = vld [vmem:[#allocation3 + $0x304] sm:$0xf]  ;;  %v2612_v2 = vor.u32 %v3670_v50, %v2609_v51  ;;  %v2679_v50 = vld [vmem:[#allocation3 + $0x188] sm:$0xf] }
  0x61   :  { %1574 = vmatpush.bf16.msra.mxu0 %v2660_v21  ;;  %v2865_v59 = vld [vmem:[#allocation3 + $0x310] sm:$0xf0]  ;;  %v3766_v60 = vld [vmem:[#allocation3 + $0x404] sm:$0xf]  ;;  %v2740_v6 = vor.u32 %v3702_v54, %v2737_v55  ;;  %v3665_v21 = vld [vmem:[#allocation3 + $0xd4] sm:$0xf0] }
  0x62   :  { %1588 = vmatpush.bf16.msra.mxu1 %v2788_v22  ;;  %v2993_v61 = vld [vmem:[#allocation3 + $0x410] sm:$0xf0]  ;;  %v3826_v62 = vld [vmem:[#allocation3 + $0x5e4] sm:$0xf]  ;;  %v2868_v7 = vor.u32 %v3734_v56, %v2865_v59  ;;  %v2711_v22 = vld [vmem:[#allocation3 + $0x1c8] sm:$0xf]  ;;  %v2584_v27 = vor.u32 %v3665_v21, %v2583_v20 }
  0x63   :  { %v3233_v63 = vld [vmem:[#allocation3 + $0x5f0] sm:$0xf0]  ;;  %v3858_v0 = vld [vmem:[#allocation3 + $0x6e4] sm:$0xf]  ;;  %v2996_v10 = vor.u32 %v3766_v60, %v2993_v61  ;;  %v3689_v51 = vld [vmem:[#allocation3 + $0x194] sm:$0xf0] }
  0x64   :  { %1602 = vmatpush.bf16.msra.mxu2 %v2916_v23  ;;  %1616 = vmatpush.bf16.msra.mxu3 %v3044_v28  ;;  %v3361_v3 = vld [vmem:[#allocation3 + $0x6f0] sm:$0xf0]  ;;  %v3236_v11 = vor.u32 %v3826_v62, %v3233_v63  ;;  %v3822_v15 = vld [vmem:[#allocation3 + $0x5c4] sm:$0xf]  ;;  %v3697_v23 = vld [vmem:[#allocation3 + $0x1d4] sm:$0xf0]  ;;  %v2680_v59 = vor.u32 %v3689_v51, %v2679_v50 }
  0x65   :  { %1575 = vmatpush.bf16.msra.mxu0 %v2644_v34  ;;  %v3364_v13 = vor.u32 %v3858_v0, %v3361_v3  ;;  %v3217_v16 = vld [vmem:[#allocation3 + $0x5d0] sm:$0xf0]  ;;  %v3854_v17 = vld [vmem:[#allocation3 + $0x6c4] sm:$0xf]  ;;  %v2712_v31 = vor.u32 %v3697_v23, %v2711_v22  ;;  %v3661_v34 = vld [vmem:[#allocation3 + $0xb4] sm:$0xf0] }
  0x66   :  { %1589 = vmatpush.bf16.msra.mxu1 %v2772_v35  ;;  %v3345_v19 = vld [vmem:[#allocation3 + $0x6d0] sm:$0xf0]  ;;  %v3220_v25 = vor.u32 %v3822_v15, %v3217_v16  ;;  %v3818_v28 = vld [vmem:[#allocation3 + $0x5a4] sm:$0xf]  ;;  %v2695_v35 = vld [vmem:[#allocation3 + $0x1a8] sm:$0xf]  ;;  %v2568_v40 = vor.u32 %v3661_v34, %v2567_v33 }
  0x67   :  { %v3348_v26 = vor.u32 %v3854_v17, %v3345_v19  ;;  %v3201_v29 = vld [vmem:[#allocation3 + $0x5b0] sm:$0xf0]  ;;  %v3850_v30 = vld [vmem:[#allocation3 + $0x6a4] sm:$0xf]  ;;  %v2535_v61 = vld [vmem:[#allocation3 + $0x68] sm:$0xf] }
  0x68   :  { %1603 = vmatpush.bf16.msra.mxu2 %v2900_v36  ;;  %1617 = vmatpush.bf16.msra.mxu3 %v3028_v41  ;;  %v3329_v32 = vld [vmem:[#allocation3 + $0x6b0] sm:$0xf0]  ;;  %v3693_v36 = vld [vmem:[#allocation3 + $0x1b4] sm:$0xf0]  ;;  %v3204_v37 = vor.u32 %v3818_v28, %v3201_v29  ;;  %v3814_v41 = vld [vmem:[#allocation3 + $0x584] sm:$0xf] }
  0x69   :  { %1576 = vmatpush.bf16.msra.mxu0 %v2628_v49  ;;  %v3332_v39 = vor.u32 %v3850_v30, %v3329_v32  ;;  %v3185_v44 = vld [vmem:[#allocation3 + $0x590] sm:$0xf0]  ;;  %v3846_v45 = vld [vmem:[#allocation3 + $0x684] sm:$0xf]  ;;  %v2696_v46 = vor.u32 %v3693_v36, %v2695_v35  ;;  %v3657_v49 = vld [vmem:[#allocation3 + $0x94] sm:$0xf0] }
  0x6a   :  { %1590 = vmatpush.bf16.msra.mxu1 %v2756_v52  ;;  %v3313_v47 = vld [vmem:[#allocation3 + $0x690] sm:$0xf0]  ;;  %v3188_v52 = vor.u32 %v3814_v41, %v3185_v44  ;;  %v2552_v54 = vor.u32 %v3657_v49, %v2551_v48  ;;  %v3810_v55 = vld [vmem:[#allocation3 + $0x564] sm:$0xf]  ;;  %v3653_v62 = vld [vmem:[#allocation3 + $0x74] sm:$0xf0] }
  0x6b   :  { %v3169_v56 = vld [vmem:[#allocation3 + $0x570] sm:$0xf0]  ;;  %v2663_v63 = vld [vmem:[#allocation3 + $0x168] sm:$0xf]  ;;  %v3685_v0 = vld [vmem:[#allocation3 + $0x174] sm:$0xf0]  ;;  %v2536_v4 = vor.u32 %v3653_v62, %v2535_v61 }
  0x6c   :  { %1604 = vmatpush.bf16.msra.mxu2 %v2884_v53  ;;  %1618 = vmatpush.bf16.msra.mxu3 %v3012_v57  ;;  %v3316_v53 = vor.u32 %v3846_v45, %v3313_v47  ;;  %v3842_v57 = vld [vmem:[#allocation3 + $0x664] sm:$0xf]  ;;  %v3297_v60 = vld [vmem:[#allocation3 + $0x670] sm:$0xf0]  ;;  %v2664_v8 = vor.u32 %v3685_v0, %v2663_v63  ;;  %v2503_v23 = vld [vmem:[#allocation3 + $0x28] sm:$0xf] }
  0x6d   :  { %1577 = vmatpush.bf16.msra.mxu0 %v2612_v2  ;;  %v3172_v2 = vor.u32 %v3810_v55, %v3169_v56  ;;  %v3300_v3 = vor.u32 %v3842_v57, %v3297_v60  ;;  %v3806_v5 = vld [vmem:[#allocation3 + $0x544] sm:$0xf]  ;;  %v3281_v9 = vld [vmem:[#allocation3 + $0x650] sm:$0xf0]  ;;  %v2487_v35 = vld [vmem:[#allocation3 + $0x8] sm:$0xf] }
  0x6e   :  { %1591 = vmatpush.bf16.msra.mxu1 %v2740_v6  ;;  %v3153_v6 = vld [vmem:[#allocation3 + $0x550] sm:$0xf0]  ;;  %v3834_v20 = vld [vmem:[#allocation3 + $0x624] sm:$0xf]  ;;  %v2855_v41 = vld [vmem:[#allocation3 + $0x2e8] sm:$0xf] }
  0x6f   :  { %v3156_v15 = vor.u32 %v3806_v5, %v3153_v6  ;;  %v3137_v19 = vld [vmem:[#allocation3 + $0x530] sm:$0xf0]  ;;  %v3798_v29 = vld [vmem:[#allocation3 + $0x504] sm:$0xf]  ;;  %v3733_v44 = vld [vmem:[#allocation3 + $0x2f4] sm:$0xf0] }
  0x70   :  { %1605 = vmatpush.bf16.msra.mxu2 %v2868_v7  ;;  %1619 = vmatpush.bf16.msra.mxu3 %v2996_v10  ;;  %v3838_v7 = vld [vmem:[#allocation3 + $0x644] sm:$0xf]  ;;  %v2519_v10 = vld [vmem:[#allocation3 + $0x48] sm:$0xf]  ;;  %v3265_v22 = vld [vmem:[#allocation3 + $0x630] sm:$0xf0]  ;;  %v2856_v55 = vor.u32 %v3733_v44, %v2855_v41 }
  0x71   :  { %1626 = vmatpush.bf16.msrb.mxu0 %v3236_v11  ;;  %1592 = vmatmul.bf16.vlgmr.msra.gmra.mxu1 %v4062_v1  ;;  %v3649_v11 = vld [vmem:[#allocation3 + $0x54] sm:$0xf0]  ;;  %v3284_v16 = vor.u32 %v3838_v7, %v3281_v9  ;;  %v3121_v30 = vld [vmem:[#allocation3 + $0x510] sm:$0xf0]  ;;  %v3830_v33 = vld [vmem:[#allocation3 + $0x604] sm:$0xf] }
  0x72   :  { %1640 = vmatpush.bf16.msrb.mxu1 %v3364_v13  ;;  %1578 = vmatmul.bf16.vlgmr.msra.gmra.mxu0 %v4072_v12  ;;  %v2647_v13 = vld [vmem:[#allocation3 + $0x148] sm:$0xf]  ;;  %v2520_v17 = vor.u32 %v3649_v11, %v2519_v10  ;;  %v3249_v34 = vld [vmem:[#allocation3 + $0x610] sm:$0xf0]  ;;  %v3765_v47 = vld [vmem:[#allocation3 + $0x3f4] sm:$0xf0] }
  0x73   :  { %1606 = vmatmul.bf16.vlgmr.msra.gmra.mxu2 %v4081_v24  ;;  %1620 = vmatmul.bf16.vlgmr.msra.gmra.mxu3 %v4102_v38  ;;  %v2983_v45 = vld [vmem:[#allocation3 + $0x3e8] sm:$0xf]  ;;  %v3797_v49 = vld [vmem:[#allocation3 + $0x4f4] sm:$0xf0]  ;;  %v3252_v50 = vor.u32 %v3830_v33, %v3249_v34 }
  0x74   :  { %1654 = vmatpush.bf16.msrb.mxu2 %v2600_v14  ;;  %1668 = vmatpush.bf16.msrb.mxu3 %v2728_v18  ;;  %v3681_v14 = vld [vmem:[#allocation3 + $0x154] sm:$0xf0]  ;;  %v3802_v18 = vld [vmem:[#allocation3 + $0x524] sm:$0xf]  ;;  %v3111_v48 = vld [vmem:[#allocation3 + $0x4e8] sm:$0xf]  ;;  %v2984_v56 = vor.u32 %v3765_v47, %v2983_v45 }
  0x75   :  { %1627 = vmatpush.bf16.msrb.mxu0 %v3220_v25  ;;  %v2648_v21 = vor.u32 %v3681_v14, %v2647_v13  ;;  %v3645_v25 = vld [vmem:[#allocation3 + $0x34] sm:$0xf0]  ;;  %v3140_v28 = vor.u32 %v3802_v18, %v3137_v19  ;;  %v3112_v57 = vor.u32 %v3797_v49, %v3111_v48  ;;  %v2967_v61 = vld [vmem:[#allocation3 + $0x3c8] sm:$0xf] }
  0x76   :  { %1641 = vmatpush.bf16.msrb.mxu1 %v3348_v26  ;;  %v2631_v26 = vld [vmem:[#allocation3 + $0x128] sm:$0xf]  ;;  %v2504_v32 = vor.u32 %v3645_v25, %v2503_v23  ;;  %v3729_v60 = vld [vmem:[#allocation3 + $0x2d4] sm:$0xf0] }
  0x77   :  { %v3761_v63 = vld [vmem:[#allocation3 + $0x3d4] sm:$0xf0]  ;;  %v3095_v0 = vld [vmem:[#allocation3 + $0x4c8] sm:$0xf] }
  0x78   :  { %1655 = vmatpush.bf16.msrb.mxu2 %v2584_v27  ;;  %1669 = vmatpush.bf16.msrb.mxu3 %v2712_v31  ;;  %v3677_v27 = vld [vmem:[#allocation3 + $0x134] sm:$0xf0]  ;;  %v3268_v31 = vor.u32 %v3834_v20, %v3265_v22  ;;  %v2968_v6 = vor.u32 %v3761_v63, %v2967_v61  ;;  %v2951_v10 = vld [vmem:[#allocation3 + $0x3a8] sm:$0xf] }
  0x79   :  { %1628 = vmatpush.bf16.msrb.mxu0 %v3204_v37  ;;  %v2632_v36 = vor.u32 %v3677_v27, %v2631_v26  ;;  %v3641_v37 = vld [vmem:[#allocation3 + $0x14] sm:$0xf0]  ;;  %v3079_v14 = vld [vmem:[#allocation3 + $0x4a8] sm:$0xf] }
  0x7a   :  { %1642 = vmatpush.bf16.msrb.mxu1 %v3332_v39  ;;  %v2615_v39 = vld [vmem:[#allocation3 + $0x108] sm:$0xf]  ;;  %v2488_v51 = vor.u32 %v3641_v37, %v2487_v35  ;;  %v3725_v9 = vld [vmem:[#allocation3 + $0x2b4] sm:$0xf0] }
  0x7b   :  { %v3757_v13 = vld [vmem:[#allocation3 + $0x3b4] sm:$0xf0]  ;;  %v2935_v23 = vld [vmem:[#allocation3 + $0x388] sm:$0xf] }
  0x7c   :  { %1656 = vmatpush.bf16.msrb.mxu2 %v2568_v40  ;;  %1670 = vmatpush.bf16.msrb.mxu3 %v2696_v46  ;;  %v3673_v40 = vld [vmem:[#allocation3 + $0x114] sm:$0xf0]  ;;  %v3124_v46 = vor.u32 %v3798_v29, %v3121_v30  ;;  %v2952_v19 = vor.u32 %v3757_v13, %v2951_v10  ;;  %v3063_v27 = vld [vmem:[#allocation3 + $0x488] sm:$0xf] }
  0x7d   :  { %1629 = vmatpush.bf16.msrb.mxu0 %v3188_v52  ;;  %v3239_v52 = vld [vmem:[#allocation3 + $0x5e8] sm:$0xf]  ;;  %v3721_v22 = vld [vmem:[#allocation3 + $0x294] sm:$0xf0] }
  0x7e   :  { %1643 = vmatpush.bf16.msrb.mxu1 %v3316_v53  ;;  %v3829_v53 = vld [vmem:[#allocation3 + $0x5f4] sm:$0xf0]  ;;  %v3191_v29 = vld [vmem:[#allocation3 + $0x588] sm:$0xf] }
  0x7f   :  { %v3240_v62 = vor.u32 %v3829_v53, %v3239_v52  ;;  %v3753_v26 = vld [vmem:[#allocation3 + $0x394] sm:$0xf0]  ;;  %v2791_v34 = vld [vmem:[#allocation3 + $0x268] sm:$0xf] }
  0x80   :  { %1657 = vmatpush.bf16.msrb.mxu2 %v2552_v54  ;;  %1671 = vmatpush.bf16.msrb.mxu3 %v2680_v59  ;;  %v2616_v54 = vor.u32 %v3673_v40, %v2615_v39  ;;  %v2839_v59 = vld [vmem:[#allocation3 + $0x2c8] sm:$0xf]  ;;  %v3817_v30 = vld [vmem:[#allocation3 + $0x594] sm:$0xf0] }
  0x81   :  { %1630 = vmatpush.bf16.msrb.mxu0 %v3172_v2  ;;  %v3793_v2 = vld [vmem:[#allocation3 + $0x4d4] sm:$0xf0]  ;;  %v2840_v5 = vor.u32 %v3729_v60, %v2839_v59  ;;  %v3192_v37 = vor.u32 %v3817_v30, %v3191_v29  ;;  %v3047_v40 = vld [vmem:[#allocation3 + $0x468] sm:$0xf] }
  0x82   :  { %1644 = vmatpush.bf16.msrb.mxu1 %v3300_v3  ;;  %v3223_v3 = vld [vmem:[#allocation3 + $0x5c8] sm:$0xf]  ;;  %v3096_v7 = vor.u32 %v3793_v2, %v3095_v0  ;;  %v3717_v35 = vld [vmem:[#allocation3 + $0x274] sm:$0xf0] }
  0x83   :  { %v3749_v39 = vld [vmem:[#allocation3 + $0x374] sm:$0xf0]  ;;  %v3175_v44 = vld [vmem:[#allocation3 + $0x568] sm:$0xf] }
  0x84   :  { %1658 = vmatpush.bf16.msrb.mxu2 %v2536_v4  ;;  %1672 = vmatpush.bf16.msrb.mxu3 %v2664_v8  ;;  %v3825_v4 = vld [vmem:[#allocation3 + $0x5d4] sm:$0xf0]  ;;  %v2823_v8 = vld [vmem:[#allocation3 + $0x2a8] sm:$0xf] }
  0x85   :  { %1631 = vmatpush.bf16.msrb.mxu0 %v3156_v15  ;;  %v3224_v11 = vor.u32 %v3825_v4, %v3223_v3  ;;  %v3789_v15 = vld [vmem:[#allocation3 + $0x4b4] sm:$0xf0]  ;;  %v2824_v18 = vor.u32 %v3725_v9, %v2823_v8  ;;  %v2775_v49 = vld [vmem:[#allocation3 + $0x248] sm:$0xf] }
  0x86   :  { %1645 = vmatpush.bf16.msrb.mxu1 %v3284_v16  ;;  %v3207_v16 = vld [vmem:[#allocation3 + $0x5a8] sm:$0xf]  ;;  %v3080_v20 = vor.u32 %v3789_v15, %v3079_v14  ;;  %v3781_v41 = vld [vmem:[#allocation3 + $0x474] sm:$0xf0] }
  0x87   :  { %v3813_v45 = vld [vmem:[#allocation3 + $0x574] sm:$0xf0]  ;;  %v3048_v48 = vor.u32 %v3781_v41, %v3047_v40  ;;  %v2887_v0 = vld [vmem:[#allocation3 + $0x328] sm:$0xf]  ;;  %v3663_v40 = vld [vmem:[#allocation3 + $0xcc] sm:$0xf] }
  0x88   :  { %1659 = vmatpush.bf16.msrb.mxu2 %v2520_v17  ;;  %1673 = vmatpush.bf16.msrb.mxu3 %v2648_v21  ;;  %v3821_v17 = vld [vmem:[#allocation3 + $0x5b4] sm:$0xf0]  ;;  %v2807_v21 = vld [vmem:[#allocation3 + $0x288] sm:$0xf]  ;;  %v3176_v52 = vor.u32 %v3813_v45, %v3175_v44  ;;  %v2585_v44 = vld [vmem:[#allocation3 + $0xd8] sm:$0xf0] }
  0x89   :  { %1632 = vmatpush.bf16.msrb.mxu0 %v3140_v28  ;;  %v3208_v25 = vor.u32 %v3821_v17, %v3207_v16  ;;  %v3785_v28 = vld [vmem:[#allocation3 + $0x494] sm:$0xf0]  ;;  %v3015_v4 = vld [vmem:[#allocation3 + $0x428] sm:$0xf]  ;;  %v3695_v45 = vld [vmem:[#allocation3 + $0x1cc] sm:$0xf] }
  0x8a   :  { %1646 = vmatpush.bf16.msrb.mxu1 %v3268_v31  ;;  %v2808_v31 = vor.u32 %v3721_v22, %v2807_v21  ;;  %v3064_v33 = vor.u32 %v3785_v28, %v3063_v27  ;;  %v3745_v53 = vld [vmem:[#allocation3 + $0x354] sm:$0xf0]  ;;  %v2743_v9 = vld [vmem:[#allocation3 + $0x208] sm:$0xf]  ;;  %v3699_v27 = vld [vmem:[#allocation3 + $0x1ec] sm:$0xf] }
  0x8b   :  { %v3709_v63 = vld [vmem:[#allocation3 + $0x234] sm:$0xf0]  ;;  %v2871_v14 = vld [vmem:[#allocation3 + $0x308] sm:$0xf]  ;;  %v2729_v28 = vld [vmem:[#allocation3 + $0x1f8] sm:$0xf0] }
  0x8c   :  { %1660 = vmatpush.bf16.msrb.mxu2 %v2504_v32  ;;  %1674 = vmatpush.bf16.msrb.mxu3 %v2632_v36  ;;  %v2936_v32 = vor.u32 %v3753_v26, %v2935_v23  ;;  %v2919_v36 = vld [vmem:[#allocation3 + $0x368] sm:$0xf]  ;;  %v3741_v3 = vld [vmem:[#allocation3 + $0x334] sm:$0xf0]  ;;  %v3667_v23 = vld [vmem:[#allocation3 + $0xec] sm:$0xf] }
  0x8d   :  { %1633 = vmatpush.bf16.msrb.mxu0 %v3124_v46  ;;  %v2792_v46 = vor.u32 %v3717_v35, %v2791_v34  ;;  %v2920_v47 = vor.u32 %v3749_v39, %v2919_v36  ;;  %v3705_v10 = vld [vmem:[#allocation3 + $0x214] sm:$0xf0]  ;;  %v2999_v16 = vld [vmem:[#allocation3 + $0x408] sm:$0xf]  ;;  %v2601_v26 = vld [vmem:[#allocation3 + $0xf8] sm:$0xf0]  ;;  %v2732_v36 = vor.u32 %v3699_v27, %v2729_v28 }
  0x8e   :  { %1647 = vmatpush.bf16.msrb.mxu1 %v3252_v50  ;;  %v3713_v50 = vld [vmem:[#allocation3 + $0x254] sm:$0xf0]  ;;  %v3367_v21 = vld [vmem:[#allocation3 + $0x6e8] sm:$0xf]  ;;  %v2604_v35 = vor.u32 %v3667_v23, %v2601_v26  ;;  %v2793_v23 = vld [vmem:[#allocation3 + $0x278] sm:$0xf0] }
  0x8f   :  { %v2776_v59 = vor.u32 %v3713_v50, %v2775_v49  ;;  %v3737_v15 = vld [vmem:[#allocation3 + $0x314] sm:$0xf0]  ;;  %v2588_v50 = vor.u32 %v3663_v40, %v2585_v44  ;;  %v3287_v28 = vld [vmem:[#allocation3 + $0x648] sm:$0xf] }
  0x90   :  { %1661 = vmatpush.bf16.msrb.mxu2 %v2488_v51  ;;  %1675 = vmatpush.bf16.msrb.mxu3 %v2616_v54  ;;  %v2903_v51 = vld [vmem:[#allocation3 + $0x348] sm:$0xf]  ;;  %v3861_v22 = vld [vmem:[#allocation3 + $0x6f4] sm:$0xf0]  ;;  %v2872_v29 = vor.u32 %v3737_v15, %v2871_v14 }
  0x91   :  { %1682 = vmatpush.bf16.msra.mxu0 %v2856_v55  ;;  %1648 = vmatmul.bf16.vlgmr.msrb.gmra.mxu1 %v4104_v42  ;;  %v3031_v54 = vld [vmem:[#allocation3 + $0x448] sm:$0xf]  ;;  %v3777_v55 = vld [vmem:[#allocation3 + $0x454] sm:$0xf0]  ;;  %v2904_v60 = vor.u32 %v3745_v53, %v2903_v51  ;;  %v3368_v34 = vor.u32 %v3861_v22, %v3367_v21  ;;  %v2665_v21 = vld [vmem:[#allocation3 + $0x178] sm:$0xf0] }
  0x92   :  { %1696 = vmatpush.bf16.msra.mxu1 %v2984_v56  ;;  %1634 = vmatmul.bf16.vlgmr.msrb.gmra.mxu0 %v4106_v43  ;;  %v3159_v56 = vld [vmem:[#allocation3 + $0x548] sm:$0xf]  ;;  %v3032_v61 = vor.u32 %v3777_v55, %v3031_v54  ;;  %v3857_v39 = vld [vmem:[#allocation3 + $0x6d4] sm:$0xf0]  ;;  %v3659_v54 = vld [vmem:[#allocation3 + $0xac] sm:$0xf] }
  0x93   :  { %1662 = vmatmul.bf16.vlgmr.msrb.gmra.mxu2 %v4057_v58  ;;  %1676 = vmatmul.bf16.vlgmr.msrb.gmra.mxu3 %v4072_v12  ;;  %v3853_v53 = vld [vmem:[#allocation3 + $0x6b4] sm:$0xf0]  ;;  %v3303_v15 = vld [vmem:[#allocation3 + $0x668] sm:$0xf]  ;;  %v3715_v22 = vld [vmem:[#allocation3 + $0x26c] sm:$0xf] }
  0x94   :  { %1710 = vmatpush.bf16.msra.mxu2 %v3112_v57  ;;  %1724 = vmatpush.bf16.msra.mxu3 %v3240_v62  ;;  %v3809_v57 = vld [vmem:[#allocation3 + $0x554] sm:$0xf0]  ;;  %v2759_v62 = vld [vmem:[#allocation3 + $0x228] sm:$0xf] }
  0x95   :  { %1683 = vmatpush.bf16.msra.mxu0 %v2840_v5  ;;  %v3160_v2 = vor.u32 %v3809_v57, %v3159_v56  ;;  %v3773_v5 = vld [vmem:[#allocation3 + $0x434] sm:$0xf0]  ;;  %v2760_v8 = vor.u32 %v3709_v63, %v2759_v62  ;;  %v2569_v56 = vld [vmem:[#allocation3 + $0xb8] sm:$0xf0]  ;;  %v3691_v57 = vld [vmem:[#allocation3 + $0x1ac] sm:$0xf] }
  0x96   :  { %1697 = vmatpush.bf16.msra.mxu1 %v2968_v6  ;;  %v3143_v6 = vld [vmem:[#allocation3 + $0x528] sm:$0xf]  ;;  %v3016_v13 = vor.u32 %v3773_v5, %v3015_v4  ;;  %v2572_v63 = vor.u32 %v3659_v54, %v2569_v56  ;;  %v3655_v4 = vld [vmem:[#allocation3 + $0x8c] sm:$0xf]  ;;  %v3837_v44 = vld [vmem:[#allocation3 + $0x634] sm:$0xf0] }
  0x97   :  { %v3833_v54 = vld [vmem:[#allocation3 + $0x614] sm:$0xf0] }
  0x98   :  { %1711 = vmatpush.bf16.msra.mxu2 %v3096_v7  ;;  %1725 = vmatpush.bf16.msra.mxu3 %v3224_v11  ;;  %v3805_v7 = vld [vmem:[#allocation3 + $0x534] sm:$0xf0]  ;;  %v2888_v11 = vor.u32 %v3741_v3, %v2887_v0 }
  0x99   :  { %1684 = vmatpush.bf16.msra.mxu0 %v2824_v18  ;;  %v3144_v17 = vor.u32 %v3805_v7, %v3143_v6  ;;  %v3769_v18 = vld [vmem:[#allocation3 + $0x414] sm:$0xf0]  ;;  %v2553_v6 = vld [vmem:[#allocation3 + $0x98] sm:$0xf0]  ;;  %v3687_v7 = vld [vmem:[#allocation3 + $0x18c] sm:$0xf] }
  0x9a   :  { %1698 = vmatpush.bf16.msra.mxu1 %v2952_v19  ;;  %v3127_v19 = vld [vmem:[#allocation3 + $0x508] sm:$0xf]  ;;  %v3000_v30 = vor.u32 %v3769_v18, %v2999_v16  ;;  %v3849_v3 = vld [vmem:[#allocation3 + $0x694] sm:$0xf0] }
  0x9b   :  { %v3845_v16 = vld [vmem:[#allocation3 + $0x674] sm:$0xf0] }
  0x9c   :  { %1712 = vmatpush.bf16.msra.mxu2 %v3080_v20  ;;  %1726 = vmatpush.bf16.msra.mxu3 %v3208_v25  ;;  %v3801_v20 = vld [vmem:[#allocation3 + $0x514] sm:$0xf0]  ;;  %v2744_v25 = vor.u32 %v3705_v10, %v2743_v9  ;;  %v3719_v9 = vld [vmem:[#allocation3 + $0x28c] sm:$0xf]  ;;  %v2809_v10 = vld [vmem:[#allocation3 + $0x298] sm:$0xf0] }
  0x9d   :  { %1685 = vmatpush.bf16.msra.mxu0 %v2808_v31  ;;  %v3731_v31 = vld [vmem:[#allocation3 + $0x2ec] sm:$0xf]  ;;  %v2812_v18 = vor.u32 %v3719_v9, %v2809_v10 }
  0x9e   :  { %1699 = vmatpush.bf16.msra.mxu1 %v2936_v32  ;;  %v2857_v32 = vld [vmem:[#allocation3 + $0x2f8] sm:$0xf0] }
  0x9f   :  { %v2860_v41 = vor.u32 %v3731_v31, %v2857_v32  ;;  %v2796_v31 = vor.u32 %v3715_v22, %v2793_v23  ;;  %v2521_v32 = vld [vmem:[#allocation3 + $0x58] sm:$0xf0]  ;;  %v3823_v23 = vld [vmem:[#allocation3 + $0x5cc] sm:$0xf] }
  0xa0   :  { %1713 = vmatpush.bf16.msra.mxu2 %v3064_v33  ;;  %1727 = vmatpush.bf16.msra.mxu3 %v3192_v37  ;;  %v3128_v33 = vor.u32 %v3801_v20, %v3127_v19  ;;  %v3351_v37 = vld [vmem:[#allocation3 + $0x6c8] sm:$0xf]  ;;  %v2537_v19 = vld [vmem:[#allocation3 + $0x78] sm:$0xf0]  ;;  %v3683_v20 = vld [vmem:[#allocation3 + $0x16c] sm:$0xf] }
  0xa1   :  { %1686 = vmatpush.bf16.msra.mxu0 %v2792_v46  ;;  %v2713_v46 = vld [vmem:[#allocation3 + $0x1d8] sm:$0xf0]  ;;  %v3352_v49 = vor.u32 %v3857_v39, %v3351_v37  ;;  %v2668_v27 = vor.u32 %v3683_v20, %v2665_v21  ;;  %v3791_v20 = vld [vmem:[#allocation3 + $0x4cc] sm:$0xf] }
  0xa2   :  { %1700 = vmatpush.bf16.msra.mxu1 %v2920_v47  ;;  %v3727_v47 = vld [vmem:[#allocation3 + $0x2cc] sm:$0xf]  ;;  %v2716_v51 = vor.u32 %v3695_v45, %v2713_v46  ;;  %v3097_v22 = vld [vmem:[#allocation3 + $0x4d8] sm:$0xf0] }
  0xa3   :  { %v3643_v45 = vld [vmem:[#allocation3 + $0x2c] sm:$0xf] }
  0xa4   :  { %1714 = vmatpush.bf16.msra.mxu2 %v3048_v48  ;;  %1728 = vmatpush.bf16.msra.mxu3 %v3176_v52  ;;  %v2841_v48 = vld [vmem:[#allocation3 + $0x2d8] sm:$0xf0]  ;;  %v3335_v52 = vld [vmem:[#allocation3 + $0x6a8] sm:$0xf] }
  0xa5   :  { %1687 = vmatpush.bf16.msra.mxu0 %v2776_v59  ;;  %v2844_v55 = vor.u32 %v3727_v47, %v2841_v48  ;;  %v2697_v59 = vld [vmem:[#allocation3 + $0x1b8] sm:$0xf0]  ;;  %v3336_v62 = vor.u32 %v3853_v53, %v3335_v52  ;;  %v3675_v48 = vld [vmem:[#allocation3 + $0x12c] sm:$0xf]  ;;  %v3255_v53 = vld [vmem:[#allocation3 + $0x608] sm:$0xf] }
  0xa6   :  { %1701 = vmatpush.bf16.msra.mxu1 %v2904_v60  ;;  %v3723_v60 = vld [vmem:[#allocation3 + $0x2ac] sm:$0xf]  ;;  %v2700_v0 = vor.u32 %v3691_v57, %v2697_v59  ;;  %v2505_v47 = vld [vmem:[#allocation3 + $0x38] sm:$0xf0] }
  0xa7   :  { %v3639_v57 = vld [vmem:[#allocation3 + $0xc] sm:$0xf]  ;;  %v2489_v59 = vld [vmem:[#allocation3 + $0x18] sm:$0xf0] }
  0xa8   :  { %1715 = vmatpush.bf16.msra.mxu2 %v3032_v61  ;;  %1729 = vmatpush.bf16.msra.mxu3 %v3160_v2  ;;  %v2825_v61 = vld [vmem:[#allocation3 + $0x2b8] sm:$0xf0]  ;;  %v3319_v2 = vld [vmem:[#allocation3 + $0x688] sm:$0xf]  ;;  %v2492_v9 = vor.u32 %v3639_v57, %v2489_v59  ;;  %v3779_v59 = vld [vmem:[#allocation3 + $0x46c] sm:$0xf] }
  0xa9   :  { %1688 = vmatpush.bf16.msra.mxu0 %v2760_v8  ;;  %v2828_v5 = vor.u32 %v3723_v60, %v2825_v61  ;;  %v2681_v8 = vld [vmem:[#allocation3 + $0x198] sm:$0xf0]  ;;  %v3671_v60 = vld [vmem:[#allocation3 + $0x10c] sm:$0xf] }
  0xaa   :  { %1702 = vmatpush.bf16.msra.mxu1 %v2888_v11  ;;  %v3320_v11 = vor.u32 %v3849_v3, %v3319_v2  ;;  %v2684_v14 = vor.u32 %v3687_v7, %v2681_v8  ;;  %v3763_v2 = vld [vmem:[#allocation3 + $0x3ec] sm:$0xf]  ;;  %v2985_v3 = vld [vmem:[#allocation3 + $0x3f8] sm:$0xf0] }
  0xab   :  { %v3827_v7 = vld [vmem:[#allocation3 + $0x5ec] sm:$0xf]  ;;  %v3241_v8 = vld [vmem:[#allocation3 + $0x5f8] sm:$0xf0] }
  0xac   :  { %1716 = vmatpush.bf16.msra.mxu2 %v3016_v13  ;;  %1730 = vmatpush.bf16.msra.mxu3 %v3144_v17  ;;  %v2556_v13 = vor.u32 %v3655_v4, %v2553_v6  ;;  %v3651_v17 = vld [vmem:[#allocation3 + $0x6c] sm:$0xf]  ;;  %v3113_v6 = vld [vmem:[#allocation3 + $0x4f8] sm:$0xf0] }
  0xad   :  { %1689 = vmatpush.bf16.msra.mxu0 %v2744_v25  ;;  %v3304_v25 = vor.u32 %v3845_v16, %v3303_v15  ;;  %v2540_v26 = vor.u32 %v3651_v17, %v2537_v19  ;;  %v3795_v4 = vld [vmem:[#allocation3 + $0x4ec] sm:$0xf]  ;;  %v2988_v15 = vor.u32 %v3763_v2, %v2985_v3  ;;  %v3244_v17 = vor.u32 %v3827_v7, %v3241_v8  ;;  %v2969_v19 = vld [vmem:[#allocation3 + $0x3d8] sm:$0xf0] }
  0xae   :  { %1703 = vmatpush.bf16.msra.mxu1 %v2872_v29  ;;  %v3841_v29 = vld [vmem:[#allocation3 + $0x654] sm:$0xf0]  ;;  %v3116_v16 = vor.u32 %v3795_v4, %v3113_v6  ;;  %v2921_v57 = vld [vmem:[#allocation3 + $0x378] sm:$0xf0]  ;;  %v3743_v7 = vld [vmem:[#allocation3 + $0x34c] sm:$0xf] }
  0xaf   :  { %v3288_v37 = vor.u32 %v3841_v29, %v3287_v28  ;;  %v3100_v29 = vor.u32 %v3791_v20, %v3097_v22  ;;  %v3305_v2 = vld [vmem:[#allocation3 + $0x678] sm:$0xf0]  ;;  %v3739_v22 = vld [vmem:[#allocation3 + $0x32c] sm:$0xf] }
  0xb0   :  { %1717 = vmatpush.bf16.msra.mxu2 %v3000_v30  ;;  %1731 = vmatpush.bf16.msra.mxu3 %v3128_v33  ;;  %v3647_v30 = vld [vmem:[#allocation3 + $0x4c] sm:$0xf]  ;;  %v2905_v8 = vld [vmem:[#allocation3 + $0x358] sm:$0xf0] }
  0xb1   :  { %1738 = vmatpush.bf16.msrb.mxu0 %v3368_v34  ;;  %1704 = vmatmul.bf16.vlgmr.msra.gmra.mxu1 %v4081_v24  ;;  %v3679_v33 = vld [vmem:[#allocation3 + $0x14c] sm:$0xf]  ;;  %v2649_v34 = vld [vmem:[#allocation3 + $0x158] sm:$0xf0]  ;;  %v2524_v39 = vor.u32 %v3647_v30, %v2521_v32 }
  0xb2   :  { %1752 = vmatpush.bf16.msrb.mxu1 %v2604_v35  ;;  %1690 = vmatmul.bf16.vlgmr.msra.gmra.mxu0 %v4062_v1  ;;  %v3711_v35 = vld [vmem:[#allocation3 + $0x24c] sm:$0xf]  ;;  %v2652_v40 = vor.u32 %v3679_v33, %v2649_v34  ;;  %v2953_v32 = vld [vmem:[#allocation3 + $0x3b8] sm:$0xf0] }
  0xb3   :  { %1718 = vmatmul.bf16.vlgmr.msra.gmra.mxu2 %v4102_v38  ;;  %1732 = vmatmul.bf16.vlgmr.msra.gmra.mxu3 %v4106_v43  ;;  %v3787_v33 = vld [vmem:[#allocation3 + $0x4ac] sm:$0xf] }
  0xb4   :  { %1766 = vmatpush.bf16.msrb.mxu2 %v2732_v36  ;;  %1780 = vmatpush.bf16.msrb.mxu3 %v2860_v41  ;;  %v2777_v36 = vld [vmem:[#allocation3 + $0x258] sm:$0xf0]  ;;  %v3271_v41 = vld [vmem:[#allocation3 + $0x628] sm:$0xf] }
  0xb5   :  { %1739 = vmatpush.bf16.msrb.mxu0 %v3352_v49  ;;  %v2780_v46 = vor.u32 %v3711_v35, %v2777_v36  ;;  %v2633_v49 = vld [vmem:[#allocation3 + $0x138] sm:$0xf0]  ;;  %v3272_v52 = vor.u32 %v3837_v44, %v3271_v41  ;;  %v3819_v36 = vld [vmem:[#allocation3 + $0x5ac] sm:$0xf] }
  0xb6   :  { %1753 = vmatpush.bf16.msrb.mxu1 %v2588_v50  ;;  %v3707_v50 = vld [vmem:[#allocation3 + $0x22c] sm:$0xf]  ;;  %v2636_v56 = vor.u32 %v3675_v48, %v2633_v49  ;;  %v3081_v35 = vld [vmem:[#allocation3 + $0x4b8] sm:$0xf0] }
  0xb7   :  { %v3084_v44 = vor.u32 %v3787_v33, %v3081_v35  ;;  %v3783_v48 = vld [vmem:[#allocation3 + $0x48c] sm:$0xf] }
  0xb8   :  { %1767 = vmatpush.bf16.msrb.mxu2 %v2716_v51  ;;  %1781 = vmatpush.bf16.msrb.mxu3 %v2844_v55  ;;  %v2761_v51 = vld [vmem:[#allocation3 + $0x238] sm:$0xf0]  ;;  %v2508_v55 = vor.u32 %v3643_v45, %v2505_v47  ;;  %v4130_v3 = vpop.f32.mrf.mxu1  ;;  %v3735_v35 = vld [vmem:[#allocation3 + $0x30c] sm:$0xf] }
  0xb9   :  { %1740 = vmatpush.bf16.msrb.mxu0 %v3336_v62  ;;  %v2764_v61 = vor.u32 %v3707_v50, %v2761_v51  ;;  %v2617_v62 = vld [vmem:[#allocation3 + $0x118] sm:$0xf0]  ;;  %v3815_v51 = vld [vmem:[#allocation3 + $0x58c] sm:$0xf] }
  0xba   :  { %1754 = vmatpush.bf16.msrb.mxu1 %v2572_v63  ;;  %v3703_v63 = vld [vmem:[#allocation3 + $0x20c] sm:$0xf]  ;;  %v2620_v10 = vor.u32 %v3671_v60, %v2617_v62  ;;  %v2937_v47 = vld [vmem:[#allocation3 + $0x398] sm:$0xf0] }
  0xbb   :  { %v3065_v50 = vld [vmem:[#allocation3 + $0x498] sm:$0xf0]  ;;  %v3811_v62 = vld [vmem:[#allocation3 + $0x56c] sm:$0xf] }
  0xbc   :  { %1768 = vmatpush.bf16.msrb.mxu2 %v2700_v0  ;;  %1782 = vmatpush.bf16.msrb.mxu3 %v2828_v5  ;;  %v2745_v0 = vld [vmem:[#allocation3 + $0x218] sm:$0xf0]  ;;  %v3256_v5 = vor.u32 %v3833_v54, %v3255_v53  ;;  %v4128_v54 = vpop.f32.mrf.mxu0 }
  0xbd   :  { %1741 = vmatpush.bf16.msrb.mxu0 %v3320_v11  ;;  %v3859_v11 = vld [vmem:[#allocation3 + $0x6ec] sm:$0xf]  ;;  %v3321_v53 = vld [vmem:[#allocation3 + $0x698] sm:$0xf0] }
  0xbe   :  { %1755 = vmatpush.bf16.msrb.mxu1 %v2556_v13  ;;  %v3369_v13 = vld [vmem:[#allocation3 + $0x6f8] sm:$0xf0] }
  0xbf   :  { %v3372_v21 = vor.u32 %v3859_v11, %v3369_v13  ;;  %v3033_v13 = vld [vmem:[#allocation3 + $0x458] sm:$0xf0] }
  0xc0   :  { %1769 = vmatpush.bf16.msrb.mxu2 %v2684_v14  ;;  %1783 = vmatpush.bf16.msrb.mxu3 %v2812_v18  ;;  %v2748_v14 = vor.u32 %v3703_v63, %v2745_v0  ;;  %v3759_v18 = vld [vmem:[#allocation3 + $0x3cc] sm:$0xf]  ;;  %v3177_v63 = vld [vmem:[#allocation3 + $0x578] sm:$0xf0] }
  0xc1   :  { %1742 = vmatpush.bf16.msrb.mxu0 %v3304_v25  ;;  %v3225_v25 = vld [vmem:[#allocation3 + $0x5d8] sm:$0xf0]  ;;  %v2972_v28 = vor.u32 %v3759_v18, %v2969_v19  ;;  %v3843_v0 = vld [vmem:[#allocation3 + $0x66c] sm:$0xf]  ;;  %v3180_v6 = vor.u32 %v3811_v62, %v3177_v63  ;;  %v2908_v19 = vor.u32 %v3743_v7, %v2905_v8  ;;  %v3423_v62 = vld [vmem:[#allocation5 + $0x60] sm:$0xf] }
  0xc2   :  { %1756 = vmatpush.bf16.msrb.mxu1 %v2540_v26  ;;  %v3855_v26 = vld [vmem:[#allocation3 + $0x6cc] sm:$0xf]  ;;  %v3228_v30 = vor.u32 %v3823_v23, %v3225_v25  ;;  %v3308_v11 = vor.u32 %v3843_v0, %v3305_v2  ;;  %v4137_v18 = vld [vmem:[%s4170_s2] sm:$0xf]  ;;  %v3875_v63 = vld [vmem:[#allocation5 + $0x64] sm:$0xf0] }
  0xc3   :  { %v2889_v23 = vld [vmem:[#allocation3 + $0x338] sm:$0xf0]  ;;  %v3771_v25 = vld [vmem:[#allocation3 + $0x42c] sm:$0xf]  ;;  %v294_v33 = vperm.slane %v4137_v18, 0  ;;  %v3424_v7 = vor.u32 %v3875_v63, %v3423_v62 }
  0xc4   :  { %1770 = vmatpush.bf16.msrb.mxu2 %v2668_v27  ;;  %1784 = vmatpush.bf16.msrb.mxu3 %v2796_v31  ;;  %v3353_v27 = vld [vmem:[#allocation3 + $0x6d8] sm:$0xf0]  ;;  %v3755_v31 = vld [vmem:[#allocation3 + $0x3ac] sm:$0xf]  ;;  %v3415_v8 = vld [vmem:[#allocation5 + $0x50] sm:$0xf] }
  0xc5   :  { %1743 = vmatpush.bf16.msrb.mxu0 %v3288_v37  ;;  %v3356_v34 = vor.u32 %v3855_v26, %v3353_v27  ;;  %v3209_v37 = vld [vmem:[#allocation3 + $0x5b8] sm:$0xf0]  ;;  %v2956_v41 = vor.u32 %v3755_v31, %v2953_v32  ;;  %v1469_v26 = vpop.f32.mrf.mxu0  ;;  %v3835_v31 = vld [vmem:[#allocation3 + $0x62c] sm:$0xf]  ;;  %v3876_v62 = vld [vmem:[#allocation5 + $0x74] sm:$0xf] }
  0xc6   :  { %1757 = vmatpush.bf16.msrb.mxu1 %v2524_v39  ;;  %v3851_v39 = vld [vmem:[#allocation3 + $0x6ac] sm:$0xf]  ;;  %v3212_v45 = vor.u32 %v3819_v36, %v3209_v37  ;;  %v3273_v32 = vld [vmem:[#allocation3 + $0x638] sm:$0xf0] }
  0xc8   :  { %1771 = vmatpush.bf16.msrb.mxu2 %v2652_v40  ;;  %1785 = vmatpush.bf16.msrb.mxu3 %v2780_v46  ;;  %v3337_v40 = vld [vmem:[#allocation3 + $0x6b8] sm:$0xf0]  ;;  %v3751_v46 = vld [vmem:[#allocation3 + $0x38c] sm:$0xf] }
  0xc9   :  { %1744 = vmatpush.bf16.msrb.mxu0 %v3272_v52  ;;  %v3340_v49 = vor.u32 %v3851_v39, %v3337_v40  ;;  %v3847_v52 = vld [vmem:[#allocation3 + $0x68c] sm:$0xf]  ;;  %v2873_v39 = vld [vmem:[#allocation3 + $0x318] sm:$0xf0] }
  0xca   :  { %1758 = vmatpush.bf16.msrb.mxu1 %v2508_v55  ;;  %v3324_v60 = vor.u32 %v3847_v52, %v3321_v53  ;;  %v3767_v40 = vld [vmem:[#allocation3 + $0x40c] sm:$0xf]  ;;  %v1468_v52 = vadd.f32 %v4128_v54, %v294_v33  ;;  %v3891_v54 = vld [vmem:[#allocation5 + $0xe4] sm:$0xf0] }
  0xcc   :  { %1772 = vmatpush.bf16.msrb.mxu2 %v2636_v56  ;;  %1786 = vmatpush.bf16.msrb.mxu3 %v2764_v61  ;;  %v3747_v56 = vld [vmem:[#allocation3 + $0x36c] sm:$0xf]  ;;  %v3049_v61 = vld [vmem:[#allocation3 + $0x478] sm:$0xf0] }
  0xcd   :  { %1745 = vmatpush.bf16.msrb.mxu0 %v3256_v5  ;;  %v2924_v4 = vor.u32 %v3747_v56, %v2921_v57  ;;  %v3052_v5 = vor.u32 %v3779_v59, %v3049_v61  ;;  %v1470_v56 = vadd.f32 %v1469_v26, %v294_v33 }
  0xce   :  { %1759 = vmatpush.bf16.msrb.mxu1 %v2492_v9  ;;  %v3775_v9 = vld [vmem:[#allocation3 + $0x44c] sm:$0xf] }
  0xcf   :  { %v3036_v20 = vor.u32 %v3775_v9, %v3033_v13  ;;  %v1523_v2 = vpop.f32.mrf.mxu0  ;;  %v3873_v9 = vld [vmem:[#allocation5 + $0x54] sm:$0xf0] }
  0xd0   :  { %1773 = vmatpush.bf16.msrb.mxu2 %v2620_v10  ;;  %1787 = vmatpush.bf16.msrb.mxu3 %v2748_v14  ;;  %v4132_v10 = vpop.f32.mrf.mxu2  ;;  %v3807_v14 = vld [vmem:[#allocation3 + $0x54c] sm:$0xf] }
  0xd1   :  { %1794 = vmatpush.bf16.msra.mxu0 %v2988_v15  ;;  %1760 = vmatmul.bf16.vlgmr.msrb.gmra.mxu1 %v4057_v58  ;;  %v3068_v58 = vor.u32 %v3783_v48, %v3065_v50  ;;  %v3161_v15 = vld [vmem:[#allocation3 + $0x558] sm:$0xf0]  ;;  %v3831_v48 = vld [vmem:[#allocation3 + $0x60c] sm:$0xf] }
  0xd2   :  { %1808 = vmatpush.bf16.msra.mxu1 %v3116_v16  ;;  %1746 = vmatmul.bf16.vlgmr.msrb.gmra.mxu0 %v4104_v42  ;;  %v3839_v16 = vld [vmem:[#allocation3 + $0x64c] sm:$0xf]  ;;  %v3257_v50 = vld [vmem:[#allocation3 + $0x618] sm:$0xf0] }
  0xd3   :  { %1774 = vmatmul.bf16.vlgmr.msrb.gmra.mxu2 %v4072_v12  ;;  %1788 = vmatmul.bf16.vlgmr.msrb.gmra.mxu3 %v4062_v1  ;;  %v3193_v12 = vld [vmem:[#allocation3 + $0x598] sm:$0xf0]  ;;  %v2940_v1 = vor.u32 %v3751_v46, %v2937_v47  ;;  %v3799_v46 = vld [vmem:[#allocation3 + $0x50c] sm:$0xf] }
  0xd4   :  { %1822 = vmatpush.bf16.msra.mxu2 %v3244_v17  ;;  %1836 = vmatpush.bf16.msra.mxu3 %v3372_v21  ;;  %v3196_v55 = vor.u32 %v3815_v51, %v3193_v12  ;;  %v3289_v17 = vld [vmem:[#allocation3 + $0x658] sm:$0xf0]  ;;  %v3164_v21 = vor.u32 %v3807_v14, %v3161_v15  ;;  %v3431_v51 = vld [vmem:[#allocation5 + $0x70] sm:$0xf]  ;;  %v3877_v12 = vld [vmem:[#allocation5 + $0x74] sm:$0xf0] }
  0xd5   :  { %1795 = vmatpush.bf16.msra.mxu0 %v2972_v28  ;;  %v3292_v27 = vor.u32 %v3839_v16, %v3289_v17  ;;  %v3017_v28 = vld [vmem:[#allocation3 + $0x438] sm:$0xf0]  ;;  %v3432_v61 = vor.u32 %v3877_v12, %v3431_v51  ;;  %v3479_v14 = vld [vmem:[#allocation5 + $0xd0] sm:$0xf]  ;;  %v3889_v15 = vld [vmem:[#allocation5 + $0xd4] sm:$0xf0] }
  0xd6   :  { %1809 = vmatpush.bf16.msra.mxu1 %v3100_v29  ;;  %v3803_v29 = vld [vmem:[#allocation3 + $0x52c] sm:$0xf]  ;;  %v3020_v36 = vor.u32 %v3771_v25, %v3017_v28  ;;  %v3129_v47 = vld [vmem:[#allocation3 + $0x518] sm:$0xf0]  ;;  %v3887_v25 = vld [vmem:[#allocation5 + $0xc4] sm:$0xf0] }
  0xd7   :  { %v3132_v59 = vor.u32 %v3799_v46, %v3129_v47  ;;  %v3399_v28 = vld [vmem:[#allocation5 + $0x30] sm:$0xf]  ;;  %v295_v12 = vperm.slane %v4137_v18, 1 }
  0xd8   :  { %1823 = vmatpush.bf16.msra.mxu2 %v3228_v30  ;;  %1837 = vmatpush.bf16.msra.mxu3 %v3356_v34  ;;  %v3145_v30 = vld [vmem:[#allocation3 + $0x538] sm:$0xf0]  ;;  %v2892_v34 = vor.u32 %v3739_v22, %v2889_v23  ;;  %v1497_v53 = vpop.f32.mrf.mxu2  ;;  %v3480_v22 = vor.u32 %v3889_v15, %v3479_v14  ;;  %v3471_v23 = vld [vmem:[#allocation5 + $0xc0] sm:$0xf]  ;;  %v3874_v15 = vld [vmem:[#allocation5 + $0x64] sm:$0xf] }
  0xd9   :  { %1796 = vmatpush.bf16.msra.mxu0 %v2956_v41  ;;  %v3148_v37 = vor.u32 %v3803_v29, %v3145_v30  ;;  %v3001_v41 = vld [vmem:[#allocation3 + $0x418] sm:$0xf0]  ;;  %v3472_v29 = vor.u32 %v3887_v25, %v3471_v23  ;;  %v3463_v30 = vld [vmem:[#allocation5 + $0xb0] sm:$0xf] }
  0xda   :  { %1810 = vmatpush.bf16.msra.mxu1 %v3084_v44  ;;  %v1483_v44 = vpop.f32.mrf.mxu1  ;;  %v3004_v57 = vor.u32 %v3767_v40, %v3001_v41  ;;  %v3455_v41 = vld [vmem:[#allocation5 + $0xa0] sm:$0xf] }
  0xdc   :  { %1824 = vmatpush.bf16.msra.mxu2 %v3212_v45  ;;  %1838 = vmatpush.bf16.msra.mxu3 %v3340_v49  ;;  %v3276_v45 = vor.u32 %v3835_v31, %v3273_v32  ;;  %v1509_v49 = vpop.f32.mrf.mxu3 }
  0xdd   :  { %1797 = vmatpush.bf16.msra.mxu0 %v2940_v1  ;;  %v2876_v1 = vor.u32 %v3735_v35, %v2873_v39 }
  0xde   :  { %1811 = vmatpush.bf16.msra.mxu1 %v3068_v58  ;;  %v3495_v58 = vld [vmem:[#allocation5 + $0xf0] sm:$0xf] }
  0xe0   :  { %1825 = vmatpush.bf16.msra.mxu2 %v3196_v55  ;;  %1839 = vmatpush.bf16.msra.mxu3 %v3324_v60  ;;  %v3893_v55 = vld [vmem:[#allocation5 + $0xf4] sm:$0xf0]  ;;  %v3260_v60 = vor.u32 %v3831_v48, %v3257_v50 }
  0xe1   :  { %1798 = vmatpush.bf16.msra.mxu0 %v2924_v4  ;;  %v3496_v0 = vor.u32 %v3893_v55, %v3495_v58  ;;  %v3487_v4 = vld [vmem:[#allocation5 + $0xe0] sm:$0xf]  ;;  %v3865_v50 = vld [vmem:[#allocation5 + $0x14] sm:$0xf0] }
  0xe2   :  { %1812 = vmatpush.bf16.msra.mxu1 %v3052_v5  ;;  %v1482_v5 = vadd.f32 %v4130_v3, %v1468_v52  ;;  %v1537_v13 = vpop.f32.mrf.mxu1  ;;  %v3447_v52 = vld [vmem:[#allocation5 + $0x90] sm:$0xf] }
  0xe4   :  { %1826 = vmatpush.bf16.msra.mxu2 %v3180_v6  ;;  %1840 = vmatpush.bf16.msra.mxu3 %v3308_v11  ;;  %v1484_v6 = vadd.f32 %v1483_v44, %v1470_v56  ;;  %v3488_v11 = vor.u32 %v3891_v54, %v3487_v4  ;;  %v1496_v3 = vadd.f32 %v4132_v10, %v1482_v5  ;;  %v1511_v17 = vpop.f32.mrf.mxu3  ;;  %v3869_v10 = vld [vmem:[#allocation5 + $0x34] sm:$0xf0]  ;;  %v3883_v44 = vld [vmem:[#allocation5 + $0xa4] sm:$0xf0]  ;;  %v3439_v4 = vld [vmem:[#allocation5 + $0x80] sm:$0xf] }
  0xe5   :  { %1799 = vmatpush.bf16.msra.mxu0 %v2908_v19  ;;  %v1551_v19 = vpop.f32.mrf.mxu2  ;;  %v3400_v35 = vor.u32 %v3869_v10, %v3399_v28  ;;  %v3456_v51 = vor.u32 %v3883_v44, %v3455_v41  ;;  %v3879_v54 = vld [vmem:[#allocation5 + $0x84] sm:$0xf0]  ;;  %v3559_v44 = vld [vmem:[#allocation5 + $0x170] sm:$0xf] }
  0xe6   :  { %1813 = vmatpush.bf16.msra.mxu1 %v3036_v20  ;;  %v1498_v16 = vadd.f32 %v1497_v53, %v1484_v6  ;;  %v3407_v20 = vld [vmem:[#allocation5 + $0x40] sm:$0xf]  ;;  %v3881_v53 = vld [vmem:[#allocation5 + $0x94] sm:$0xf0]  ;;  %v3892_v6 = vld [vmem:[#allocation5 + $0xf4] sm:$0xf] }
  0xe7   :  { %v3448_v63 = vor.u32 %v3881_v53, %v3447_v52  ;;  %v3884_v52 = vld [vmem:[#allocation5 + $0xb4] sm:$0xf]  ;;  %v3465_v53 = vld [vmem:[#allocation5 + $0xb8] sm:$0xf0] }
  0xe8   :  { %1827 = vmatpush.bf16.msra.mxu2 %v3164_v21  ;;  %1841 = vmatpush.bf16.msra.mxu3 %v3292_v27  ;;  %v3871_v21 = vld [vmem:[#allocation5 + $0x44] sm:$0xf0]  ;;  %v1512_v26 = vadd.f32 %v1511_v17, %v1498_v16 }
  0xe9   :  { %1800 = vmatpush.bf16.msra.mxu0 %v2892_v34  ;;  %v3408_v27 = vor.u32 %v3871_v21, %v3407_v20  ;;  %v3489_v20 = vld [vmem:[#allocation5 + $0xe8] sm:$0xf0] }
  0xea   :  { %1814 = vmatpush.bf16.msra.mxu1 %v3020_v36  ;;  %v1539_v34 = vpop.f32.mrf.mxu1  ;;  %v3391_v36 = vld [vmem:[#allocation5 + $0x20] sm:$0xf] }
  0xec   :  { %1828 = vmatpush.bf16.msra.mxu2 %v3148_v37  ;;  %1842 = vmatpush.bf16.msra.mxu3 %v3276_v45  ;;  %v1565_v33 = vpop.f32.mrf.mxu3  ;;  %v3867_v37 = vld [vmem:[#allocation5 + $0x24] sm:$0xf0] }
  0xed   :  { %1801 = vmatpush.bf16.msra.mxu0 %v2876_v1  ;;  %v1553_v40 = vpop.f32.mrf.mxu2  ;;  %v3392_v47 = vor.u32 %v3867_v37, %v3391_v36  ;;  %v3886_v36 = vld [vmem:[#allocation5 + $0xc4] sm:$0xf]  ;;  %v3473_v37 = vld [vmem:[#allocation5 + $0xc8] sm:$0xf0] }
  0xee   :  { %1815 = vmatpush.bf16.msra.mxu1 %v3004_v57  ;;  %v3375_v57 = vld [vmem:[#allocation5] sm:$0xf] }
  0xf0   :  { %1829 = vmatpush.bf16.msra.mxu2 %v3132_v59  ;;  %1843 = vmatpush.bf16.msra.mxu3 %v3260_v60 }
  0xf1   :  { %2260 = vmatpush.bf16.msrb.mxu0 %v3432_v61  ;;  %1816 = vmatmul.bf16.vlgmr.msra.gmra.mxu1 %v4102_v38  ;;  %v1510_v38 = vadd.f32 %v1509_v49, %v1496_v3  ;;  %v3383_v49 = vld [vmem:[#allocation5 + $0x10] sm:$0xf]  ;;  %v3863_v61 = vld [vmem:[#allocation5 + $0x4] sm:$0xf0]  ;;  %v3425_v3 = vld [vmem:[#allocation5 + $0x68] sm:$0xf0] }
  0xf2   :  { %1802 = vmatmul.bf16.vlgmr.msra.gmra.mxu0 %v4081_v24  ;;  %2274 = vmatpush.bf16.msrb.mxu1 %v3496_v0  ;;  %v3416_v24 = vor.u32 %v3873_v9, %v3415_v8  ;;  %v1593_v55 = vpop.f32.mrf.mxu1  ;;  %v3384_v56 = vor.u32 %v3865_v50, %v3383_v49  ;;  %v1566_v0 = vadd.f32 %v1565_v33, %v295_v12  ;;  %v3870_v33 = vld [vmem:[#allocation5 + $0x44] sm:$0xf]  ;;  %v3868_v49 = vld [vmem:[#allocation5 + $0x34] sm:$0xf]  ;;  %v3401_v50 = vld [vmem:[#allocation5 + $0x38] sm:$0xf0] }
  0xf3   :  { %1830 = vmatmul.bf16.vlgmr.msra.gmra.mxu2 %v4106_v43  ;;  %1844 = vmatmul.bf16.vlgmr.msra.gmra.mxu3 %v4104_v42  ;;  %v1525_v43 = vpop.f32.mrf.mxu0  ;;  %v3885_v42 = vld [vmem:[#allocation5 + $0xb4] sm:$0xf0]  ;;  %v1524_v31 = vadd.f32 %v1523_v2, %v1510_v38  ;;  %v3433_v2 = vld [vmem:[#allocation5 + $0x78] sm:$0xf0]  ;;  %v3376_v8 = vor.u32 %v3863_v61, %v3375_v57  ;;  %v3428_v23 = vor.u32 %v3874_v15, %v3425_v3  ;;  %v3551_v57 = vld [vmem:[#allocation5 + $0x160] sm:$0xf] }
  0xf4   :  { %v1526_v32 = vadd.f32 %v1525_v43, %v1512_v26  ;;  %v3464_v39 = vor.u32 %v3885_v42, %v3463_v30  ;;  %v1567_v60 = vpop.f32.mrf.mxu3  ;;  %v3872_v43 = vld [vmem:[#allocation5 + $0x54] sm:$0xf]  ;;  %v3481_v30 = vld [vmem:[#allocation5 + $0xd8] sm:$0xf0]  ;;  %v3393_v61 = vld [vmem:[#allocation5 + $0x28] sm:$0xf0] }
  0xf5   :  { %2261 = vmatpush.bf16.msrb.mxu0 %v3424_v7  ;;  %v1538_v45 = vadd.f32 %v1537_v13, %v1524_v31  ;;  %v3497_v7 = vld [vmem:[#allocation5 + $0xf8] sm:$0xf0]  ;;  %v3440_v13 = vor.u32 %v3879_v54, %v3439_v4  ;;  %v1568_v25 = vadd.f32 %v1567_v60, %v295_v12  ;;  %v3866_v60 = vld [vmem:[#allocation5 + $0x24] sm:$0xf] }
  0xf6   :  { %2275 = vmatpush.bf16.msrb.mxu1 %v3488_v11  ;;  %v1540_v46 = vadd.f32 %v1539_v34, %v1526_v32  ;;  %v3436_v11 = vor.u32 %v3876_v62, %v3433_v2  ;;  %v3500_v16 = vor.u32 %v3892_v6, %v3497_v7  ;;  %v3409_v34 = vld [vmem:[#allocation5 + $0x48] sm:$0xf0]  ;;  %v3468_v62 = vor.u32 %v3884_v52, %v3465_v53  ;;  %v3543_v7 = vld [vmem:[#allocation5 + $0x150] sm:$0xf] }
  0xf7   :  { %v1552_v1 = vadd.f32 %v1551_v19, %v1538_v45  ;;  %v1607_v19 = vpop.f32.mrf.mxu2  ;;  %v3412_v41 = vor.u32 %v3870_v33, %v3409_v34  ;;  %v3909_v45 = vld [vmem:[#allocation5 + $0x174] sm:$0xf0]  ;;  %v3457_v2 = vld [vmem:[#allocation5 + $0xa8] sm:$0xf0]  ;;  %v3396_v6 = vor.u32 %v3866_v60, %v3393_v61  ;;  %v3519_v33 = vld [vmem:[#allocation5 + $0x120] sm:$0xf] }
  0xf8   :  { %v1554_v48 = vadd.f32 %v1553_v40, %v1540_v46  ;;  %v3560_v12 = vor.u32 %v3909_v45, %v3559_v44  ;;  %v3503_v45 = vld [vmem:[#allocation5 + $0x100] sm:$0xf]  ;;  %v3553_v52 = vld [vmem:[#allocation5 + $0x168] sm:$0xf0] }
  0xf9   :  { %2262 = vmatpush.bf16.msrb.mxu0 %v3416_v24  ;;  %v1850_v5 = vmul.f32 0.2, %v1552_v1  ;;  %v3890_v24 = vld [vmem:[#allocation5 + $0xe4] sm:$0xf] }
  0xfa   :  { %2276 = vmatpush.bf16.msrb.mxu1 %v3480_v22  ;;  %v1854_v59 = vmul.f32 0.2, %v1554_v48  ;;  %v1595_v26 = vpop.f32.mrf.mxu1  ;;  %v3492_v28 = vor.u32 %v3890_v24, %v3489_v20  ;;  %2288 = vmatpush.bf16.msrb.mxu2 %v3560_v12  ;;  %v3906_v12 = vld [vmem:[#allocation5 + $0x164] sm:$0xf] }
  0xfb   :  { %v1579_v58 = vpop.f32.mrf.mxu0  ;;  %v1858_v17 = vmax.f32 %v1552_v1, %v1850_v5 }
  0xfc   :  { %v1862_v9 = vmax.f32 %v1554_v48, %v1854_v59  ;;  %v1580_v14 = vadd.f32 %v1579_v58, %v1566_v0  ;;  %v1621_v10 = vpop.f32.mrf.mxu3  ;;  %v3907_v59 = vld [vmem:[#allocation5 + $0x164] sm:$0xf0]  ;;  %v3882_v0 = vld [vmem:[#allocation5 + $0xa4] sm:$0xf] }
  0xfd   :  { %2263 = vmatpush.bf16.msrb.mxu0 %v3408_v27  ;;  %v3417_v27 = vld [vmem:[#allocation5 + $0x58] sm:$0xf0]  ;;  %v3460_v15 = vor.u32 %v3882_v0, %v3457_v2  ;;  %v3902_v0 = vld [vmem:[#allocation5 + $0x144] sm:$0xf] }
  0xfe   :  { %2277 = vmatpush.bf16.msrb.mxu1 %v3472_v29  ;;  %v4148_v21 = vpack.c.bf16 %v1862_v9, %v1858_v17  ;;  %v1594_v38 = vadd.f32 %v1593_v55, %v1580_v14  ;;  %v3888_v29 = vld [vmem:[#allocation5 + $0xd4] sm:$0xf]  ;;  %v3420_v42 = vor.u32 %v3872_v43, %v3417_v27  ;;  %v3385_v14 = vld [vmem:[#allocation5 + $0x18] sm:$0xf0] }
  0xff   :  { %v3449_v17 = vld [vmem:[#allocation5 + $0x98] sm:$0xf0] }
 0x100   :  { %v1608_v31 = vadd.f32 %v1607_v19, %v1594_v38  ;;  %v3862_v38 = vld [vmem:[#allocation5 + $0x4] sm:$0xf] }
 0x101   :  { %2264 = vmatpush.bf16.msrb.mxu0 %v3400_v35  ;;  %v3484_v35 = vor.u32 %v3888_v29, %v3481_v30 }
 0x102   :  { %2278 = vmatpush.bf16.msrb.mxu1 %v3464_v39  ;;  %v1609_v39 = vpop.f32.mrf.mxu2  ;;  %v1622_v46 = vadd.f32 %v1621_v10, %v1608_v31  ;;  %v3441_v10 = vld [vmem:[#allocation5 + $0x88] sm:$0xf0]  ;;  %v3527_v31 = vld [vmem:[#allocation5 + $0x130] sm:$0xf] }
 0x103   :  { %v1581_v22 = vpop.f32.mrf.mxu0 }
 0x104   :  { %v1582_v32 = vadd.f32 %v1581_v22, %v1568_v25  ;;  %v1623_v55 = vpop.f32.mrf.mxu3  ;;  %v3535_v22 = vld [vmem:[#allocation5 + $0x140] sm:$0xf] }
 0x105   :  { %2265 = vmatpush.bf16.msrb.mxu0 %v3392_v47 }
 0x106   :  { %2279 = vmatpush.bf16.msrb.mxu1 %v3456_v51  ;;  %v1596_v47 = vadd.f32 %v1595_v26, %v1582_v32  ;;  %v3476_v51 = vor.u32 %v3886_v36, %v3473_v37  ;;  %v3377_v26 = vld [vmem:[#allocation5 + $0x8] sm:$0xf0]  ;;  %v3901_v32 = vld [vmem:[#allocation5 + $0x134] sm:$0xf0]  ;;  %v3899_v37 = vld [vmem:[#allocation5 + $0x124] sm:$0xf0] }
 0x107   :  { %v3528_v36 = vor.u32 %v3901_v32, %v3527_v31 }
 0x108   :  { %v1610_v1 = vadd.f32 %v1609_v39, %v1596_v47  ;;  %v3520_v39 = vor.u32 %v3899_v37, %v3519_v33  ;;  %v3894_v37 = vld [vmem:[#allocation5 + $0x104] sm:$0xf] }
 0x109   :  { %2266 = vmatpush.bf16.msrb.mxu0 %v3384_v56  ;;  %v3404_v56 = vor.u32 %v3868_v49, %v3401_v50  ;;  %v3561_v49 = vld [vmem:[#allocation5 + $0x178] sm:$0xf0] }
 0x10a   :  { %2280 = vmatpush.bf16.msrb.mxu1 %v3448_v63  ;;  %v3552_v63 = vor.u32 %v3907_v59, %v3551_v57  ;;  %v1624_v4 = vadd.f32 %v1623_v55, %v1610_v1  ;;  %v3556_v1 = vor.u32 %v3906_v12, %v3553_v52  ;;  %v3904_v55 = vld [vmem:[#allocation5 + $0x154] sm:$0xf]  ;;  %v3545_v57 = vld [vmem:[#allocation5 + $0x158] sm:$0xf0]  ;;  %v296_v59 = vperm.slane %v4137_v18, 2 }
 0x10b   :  { %v3548_v60 = vor.u32 %v3904_v55, %v3545_v57  ;;  %v3625_v57 = vld [vmem:[#allocation5 + $0x1f8] sm:$0xf0] }
 0x10c   :  { %2289 = vmatpush.bf16.msrb.mxu2 %v3552_v63  ;;  %v3923_v63 = vld [vmem:[#allocation5 + $0x1e4] sm:$0xf0] }
 0x10d   :  { %2267 = vmatpush.bf16.msrb.mxu0 %v3376_v8  ;;  %v3905_v8 = vld [vmem:[#allocation5 + $0x154] sm:$0xf0] }
 0x10e   :  { %2281 = vmatpush.bf16.msrb.mxu1 %v3440_v13  ;;  %v1649_v48 = vpop.f32.mrf.mxu1  ;;  %v3864_v13 = vld [vmem:[#allocation5 + $0x14] sm:$0xf]  ;;  %v3544_v3 = vor.u32 %v3905_v8, %v3543_v7  ;;  %v3607_v8 = vld [vmem:[#allocation5 + $0x1d0] sm:$0xf] }
 0x10f   :  { %v1635_v40 = vpop.f32.mrf.mxu0  ;;  %v3388_v20 = vor.u32 %v3864_v13, %v3385_v14  ;;  %v3529_v14 = vld [vmem:[#allocation5 + $0x138] sm:$0xf0] }
 0x110   :  { %2268 = vmatmul.bf16.vlgmr.msrb.gmra.mxu0 %v4148_v21  ;;  %v1636_v58 = vadd.f32 %v1635_v40, %v1622_v46  ;;  %2290 = vmatpush.bf16.msrb.mxu2 %v3544_v3  ;;  %v3511_v40 = vld [vmem:[#allocation5 + $0x110] sm:$0xf]  ;;  %v3895_v46 = vld [vmem:[#allocation5 + $0x104] sm:$0xf0] }
 0x111   :  { %2316 = vmatpush.bf16.msra.mxu0 %v3436_v11  ;;  %v3504_v47 = vor.u32 %v3895_v46, %v3503_v45  ;;  %v3919_v3 = vld [vmem:[#allocation5 + $0x1c4] sm:$0xf0] }
 0x112   :  { %2330 = vmatpush.bf16.msra.mxu1 %v3500_v16  ;;  %v1650_v54 = vadd.f32 %v1649_v48, %v1636_v58  ;;  %v3880_v16 = vld [vmem:[#allocation5 + $0x94] sm:$0xf]  ;;  %v3623_v58 = vld [vmem:[#allocation5 + $0x1f0] sm:$0xf] }
 0x113   :  { %v3452_v43 = vor.u32 %v3880_v16, %v3449_v17  ;;  %v3908_v48 = vld [vmem:[#allocation5 + $0x174] sm:$0xf] }
 0x114   :  { %v1851_v19 = vmul.f32 0.2, %v1650_v54 }
 0x115   :  { %2317 = vmatpush.bf16.msra.mxu0 %v3428_v23  ;;  %v3903_v23 = vld [vmem:[#allocation5 + $0x144] sm:$0xf0] }
 0x116   :  { %2331 = vmatpush.bf16.msra.mxu1 %v3492_v28  ;;  %v1651_v11 = vpop.f32.mrf.mxu1  ;;  %v3536_v27 = vor.u32 %v3903_v23, %v3535_v22  ;;  %v3878_v28 = vld [vmem:[#allocation5 + $0x84] sm:$0xf]  ;;  %v1859_v29 = vmax.f32 %v1650_v54, %v1851_v19  ;;  %v1663_v50 = vpop.f32.mrf.mxu2  ;;  %v3537_v54 = vld [vmem:[#allocation5 + $0x148] sm:$0xf0] }
 0x117   :  { %v1637_v5 = vpop.f32.mrf.mxu0  ;;  %v1677_v53 = vpop.f32.mrf.mxu3  ;;  %v3898_v19 = vld [vmem:[#allocation5 + $0x124] sm:$0xf] }
 0x118   :  { %v1638_v9 = vadd.f32 %v1637_v5, %v1624_v4  ;;  %2291 = vmatpush.bf16.msrb.mxu2 %v3536_v27  ;;  %v1664_v5 = vadd.f32 %v1663_v50, %v296_v59  ;;  %v3896_v27 = vld [vmem:[#allocation5 + $0x114] sm:$0xf]  ;;  %v3913_v50 = vld [vmem:[#allocation5 + $0x194] sm:$0xf0] }
 0x119   :  { %2318 = vmatpush.bf16.msra.mxu0 %v3420_v42  ;;  %v3380_v42 = vor.u32 %v3862_v38, %v3377_v26  ;;  %v3591_v38 = vld [vmem:[#allocation5 + $0x1b0] sm:$0xf]  ;;  %v3917_v26 = vld [vmem:[#allocation5 + $0x1b4] sm:$0xf0] }
 0x11a   :  { %2332 = vmatpush.bf16.msra.mxu1 %v3484_v35  ;;  %v1652_v24 = vadd.f32 %v1651_v11, %v1638_v9  ;;  %v3444_v35 = vor.u32 %v3878_v28, %v3441_v10  ;;  %v3921_v9 = vld [vmem:[#allocation5 + $0x1d4] sm:$0xf0]  ;;  %v3900_v11 = vld [vmem:[#allocation5 + $0x134] sm:$0xf]  ;;  %v1678_v16 = vadd.f32 %v1677_v53, %v1664_v5  ;;  %v3513_v28 = vld [vmem:[#allocation5 + $0x118] sm:$0xf0] }
 0x11b   :  { %v3608_v13 = vor.u32 %v3921_v9, %v3607_v8  ;;  %v3532_v17 = vor.u32 %v3900_v11, %v3529_v14  ;;  %v3516_v31 = vor.u32 %v3896_v27, %v3513_v28  ;;  %v3920_v8 = vld [vmem:[#allocation5 + $0x1d4] sm:$0xf]  ;;  %v3609_v9 = vld [vmem:[#allocation5 + $0x1d8] sm:$0xf0] }
 0x11c   :  { %v1855_v25 = vmul.f32 0.2, %v1652_v24  ;;  %2292 = vmatpush.bf16.msrb.mxu2 %v3528_v36  ;;  %v3915_v36 = vld [vmem:[#allocation5 + $0x1a4] sm:$0xf0] }
 0x11d   :  { %2319 = vmatpush.bf16.msra.mxu0 %v3412_v41  ;;  %v3897_v41 = vld [vmem:[#allocation5 + $0x114] sm:$0xf0] }
 0x11e   :  { %2333 = vmatpush.bf16.msra.mxu1 %v3476_v51  ;;  %v1863_v30 = vmax.f32 %v1652_v24, %v1855_v25  ;;  %v3512_v44 = vor.u32 %v3897_v41, %v3511_v40  ;;  %v3564_v51 = vor.u32 %v3908_v48, %v3561_v49  ;;  %v1665_v61 = vpop.f32.mrf.mxu2  ;;  %v3521_v24 = vld [vmem:[#allocation5 + $0x128] sm:$0xf0]  ;;  %v3575_v49 = vld [vmem:[#allocation5 + $0x190] sm:$0xf] }
 0x11f   :  { %v1679_v7 = vpop.f32.mrf.mxu3  ;;  %v1666_v23 = vadd.f32 %v1665_v61, %v296_v59  ;;  %v3524_v25 = vor.u32 %v3898_v19, %v3521_v24  ;;  %v3505_v41 = vld [vmem:[#allocation5 + $0x108] sm:$0xf0]  ;;  %v3916_v24 = vld [vmem:[#allocation5 + $0x1b4] sm:$0xf] }
 0x120   :  { %v1867_v34 = vpack.c.bf16 %v1863_v30, %v1859_v29  ;;  %2293 = vmatpush.bf16.msrb.mxu2 %v3520_v39  ;;  %v3592_v30 = vor.u32 %v3917_v26, %v3591_v38  ;;  %v3508_v45 = vor.u32 %v3894_v37, %v3505_v41  ;;  %v3914_v38 = vld [vmem:[#allocation5 + $0x1a4] sm:$0xf]  ;;  %v3585_v26 = vld [vmem:[#allocation5 + $0x1a8] sm:$0xf0] }
 0x121   :  { %2320 = vmatpush.bf16.msra.mxu0 %v3404_v56  ;;  %v3588_v27 = vor.u32 %v3914_v38, %v3585_v26  ;;  %v3569_v37 = vld [vmem:[#allocation5 + $0x188] sm:$0xf0] }
 0x122   :  { %2334 = vmatpush.bf16.msra.mxu1 %v3468_v62  ;;  %v3615_v62 = vld [vmem:[#allocation5 + $0x1e0] sm:$0xf] }
 0x123   :  { %2282 = vmatmul.bf16.vlgmr.msrb.gmra.mxu1 %v1867_v34  ;;  %v3616_v4 = vor.u32 %v3923_v63, %v3615_v62 }
 0x124   :  { %2294 = vmatpush.bf16.msrb.mxu2 %v3512_v44 }
 0x125   :  { %2321 = vmatpush.bf16.msra.mxu0 %v3396_v6  ;;  %v3540_v6 = vor.u32 %v3902_v0, %v3537_v54  ;;  %v3922_v0 = vld [vmem:[#allocation5 + $0x1e4] sm:$0xf] }
 0x126   :  { %2335 = vmatpush.bf16.msra.mxu1 %v3460_v15  ;;  %v3599_v15 = vld [vmem:[#allocation5 + $0x1c0] sm:$0xf] }
 0x127   :  { %v3600_v22 = vor.u32 %v3919_v3, %v3599_v15  ;;  %v3918_v15 = vld [vmem:[#allocation5 + $0x1c4] sm:$0xf]  ;;  %v3601_v3 = vld [vmem:[#allocation5 + $0x1c8] sm:$0xf0] }
 0x128   :  { %2295 = vmatpush.bf16.msrb.mxu2 %v3504_v47  ;;  %v3604_v19 = vor.u32 %v3918_v15, %v3601_v3 }
 0x129   :  { %2322 = vmatpush.bf16.msra.mxu0 %v3388_v20 }
 0x12a   :  { %2336 = vmatpush.bf16.msra.mxu1 %v3452_v43 }
 0x12c   :  { %2344 = vmatpush.bf16.msra.mxu2 %v3564_v51  ;;  %v3576_v51 = vor.u32 %v3913_v50, %v3575_v49 }
 0x12d   :  { %2323 = vmatpush.bf16.msra.mxu0 %v3380_v42  ;;  %v1680_v42 = vadd.f32 %v1679_v7, %v1666_v23 }
 0x12e   :  { %2337 = vmatpush.bf16.msra.mxu1 %v3444_v35  ;;  %v1705_v20 = vpop.f32.mrf.mxu1  ;;  %v3583_v35 = vld [vmem:[#allocation5 + $0x1a0] sm:$0xf] }
 0x12f   :  { %v1691_v2 = vpop.f32.mrf.mxu0  ;;  %v3584_v40 = vor.u32 %v3915_v36, %v3583_v35  ;;  %v3910_v36 = vld [vmem:[#allocation5 + $0x184] sm:$0xf] }
 0x130   :  { %2324 = vmatmul.bf16.vlgmr.msra.gmra.mxu0 %v4148_v21  ;;  %2345 = vmatpush.bf16.msra.mxu2 %v3556_v1  ;;  %v3925_v21 = vld [vmem:[#allocation5 + $0x1f4] sm:$0xf0]  ;;  %v1692_v10 = vadd.f32 %v1691_v2, %v1678_v16  ;;  %v3617_v2 = vld [vmem:[#allocation5 + $0x1e8] sm:$0xf0]  ;;  %v297_v16 = vperm.slane %v4137_v18, 3 }
 0x131   :  { %v3624_v56 = vor.u32 %v3925_v21, %v3623_v58  ;;  %v3567_v58 = vld [vmem:[#allocation5 + $0x180] sm:$0xf]  ;;  %v3911_v21 = vld [vmem:[#allocation5 + $0x184] sm:$0xf0]  ;;  %v3620_v54 = vor.u32 %v3922_v0, %v3617_v2 }
 0x132   :  { %v1706_v33 = vadd.f32 %v1705_v20, %v1692_v10  ;;  %v3568_v55 = vor.u32 %v3911_v21, %v3567_v58  ;;  %v3593_v20 = vld [vmem:[#allocation5 + $0x1b8] sm:$0xf0]  ;;  %v3912_v10 = vld [vmem:[#allocation5 + $0x194] sm:$0xf] }
 0x133   :  { %2338 = vmatmul.bf16.vlgmr.msra.gmra.mxu1 %v1867_v34  ;;  %2302 = vmatpush.bf16.msrb.mxu3 %v3624_v56  ;;  %v3924_v56 = vld [vmem:[#allocation5 + $0x1f4] sm:$0xf]  ;;  %v3596_v23 = vor.u32 %v3916_v24, %v3593_v20 }
 0x134   :  { %2346 = vmatpush.bf16.msra.mxu2 %v3548_v60  ;;  %v3628_v60 = vor.u32 %v3924_v56, %v3625_v57 }
 0x136   :  { %v1719_v43 = vpop.f32.mrf.mxu2  ;;  %v1733_v32 = vpop.f32.mrf.mxu3 }
 0x137   :  { %2303 = vmatpush.bf16.msrb.mxu3 %v3616_v4  ;;  %v1693_v29 = vpop.f32.mrf.mxu0  ;;  %v1707_v39 = vpop.f32.mrf.mxu1  ;;  %v1720_v44 = vadd.f32 %v1719_v43, %v1706_v33 }
 0x138   :  { %2347 = vmatpush.bf16.msra.mxu2 %v3540_v6  ;;  %v1694_v34 = vadd.f32 %v1693_v29, %v1680_v42  ;;  %v3577_v29 = vld [vmem:[#allocation5 + $0x198] sm:$0xf0] }
 0x139   :  { %v1734_v12 = vadd.f32 %v1733_v32, %v1720_v44  ;;  %v3580_v18 = vor.u32 %v3912_v10, %v3577_v29 }
 0x13a   :  { %v1708_v48 = vadd.f32 %v1707_v39, %v1694_v34  ;;  %v3572_v39 = vor.u32 %v3910_v36, %v3569_v37 }
 0x13b   :  { %2304 = vmatpush.bf16.msrb.mxu3 %v3608_v13  ;;  %v3612_v13 = vor.u32 %v3920_v8, %v3609_v9 }
 0x13c   :  { %2348 = vmatpush.bf16.msra.mxu2 %v3532_v17 }
 0x13e   :  { %v1721_v46 = vpop.f32.mrf.mxu2  ;;  %v1735_v53 = vpop.f32.mrf.mxu3 }
 0x13f   :  { %2305 = vmatpush.bf16.msrb.mxu3 %v3600_v22  ;;  %v1722_v52 = vadd.f32 %v1721_v46, %v1708_v48 }
 0x140   :  { %2349 = vmatpush.bf16.msra.mxu2 %v3524_v25 }
 0x141   :  { %v1736_v59 = vadd.f32 %v1735_v53, %v1722_v52 }
 0x143   :  { %2306 = vmatpush.bf16.msrb.mxu3 %v3592_v30 }
 0x144   :  { %2350 = vmatpush.bf16.msra.mxu2 %v3516_v31 }
 0x147   :  { %2307 = vmatpush.bf16.msrb.mxu3 %v3584_v40 }
 0x148   :  { %2351 = vmatpush.bf16.msra.mxu2 %v3508_v45 }
 0x14b   :  { %2308 = vmatpush.bf16.msrb.mxu3 %v3576_v51 }
 0x14e   :  { %v1761_v7 = vpop.f32.mrf.mxu1 }
 0x14f   :  { %v1747_v47 = vpop.f32.mrf.mxu0  ;;  %2309 = vmatpush.bf16.msrb.mxu3 %v3568_v55  ;;  %v1762_v22 = vadd.f32 %v1761_v7, %v297_v16 }
 0x150   :  { %v1748_v1 = vadd.f32 %v1747_v47, %v1734_v12 }
 0x152   :  { %v1852_v62 = vmul.f32 0.2, %v1748_v1 }
 0x153   :  { %2358 = vmatpush.bf16.msra.mxu3 %v3628_v60 }
 0x154   :  { %v1860_v5 = vmax.f32 %v1748_v1, %v1852_v62 }
 0x156   :  { %v1775_v14 = vpop.f32.mrf.mxu2  ;;  %v1789_v17 = vpop.f32.mrf.mxu3 }
 0x157   :  { %v1749_v61 = vpop.f32.mrf.mxu0  ;;  %2359 = vmatpush.bf16.msra.mxu3 %v3620_v54  ;;  %v1763_v25 = vpop.f32.mrf.mxu1  ;;  %v1776_v43 = vadd.f32 %v1775_v14, %v1762_v22 }
 0x158   :  { %v1750_v63 = vadd.f32 %v1749_v61, %v1736_v59  ;;  %v1764_v30 = vadd.f32 %v1763_v25, %v297_v16 }
 0x159   :  { %v1790_v32 = vadd.f32 %v1789_v17, %v1776_v43 }
 0x15a   :  { %v1856_v4 = vmul.f32 0.2, %v1750_v63 }
 0x15b   :  { %2360 = vmatpush.bf16.msra.mxu3 %v3612_v13 }
 0x15c   :  { %v1864_v6 = vmax.f32 %v1750_v63, %v1856_v4  ;;  %v1934_v63 = vld [vmem:[%s4172_s4] sm:$0x3] }
 0x15d   :  { %v1936_v54 = vperm.slane %v1934_v63, 0  ;;  %v1937_v8 = vperm.slane %v1934_v63, 1 }
 0x15e   :  { %v1868_v11 = vpack.c.bf16 %v1864_v6, %v1860_v5  ;;  %v1777_v28 = vpop.f32.mrf.mxu2  ;;  %v1791_v42 = vpop.f32.mrf.mxu3 }
 0x15f   :  { %2361 = vmatpush.bf16.msra.mxu3 %v3604_v19  ;;  %v1778_v34 = vadd.f32 %v1777_v28, %v1764_v30 }
 0x160   :  { %2296 = vmatmul.bf16.vlgmr.msrb.gmra.mxu2 %v1868_v11 }
 0x161   :  { %v1792_v41 = vadd.f32 %v1791_v42, %v1778_v34 }
 0x163   :  { %2362 = vmatpush.bf16.msra.mxu3 %v3596_v23  ;;  %v2380_v23 = vld [vmem:[%s4173_s5] sm:$0x3] }
 0x164   :  { %v2382_v28 = vperm.slane %v2380_v23, 0  ;;  %v2383_v42 = vperm.slane %v2380_v23, 1 }
 0x167   :  { %2363 = vmatpush.bf16.msra.mxu3 %v3588_v27 }
 0x16b   :  { %2364 = vmatpush.bf16.msra.mxu3 %v3580_v18 }
 0x16e   :  { %v1817_v33 = vpop.f32.mrf.mxu1 }
 0x16f   :  { %v1803_v31 = vpop.f32.mrf.mxu0  ;;  %2365 = vmatpush.bf16.msra.mxu3 %v3572_v39 }
 0x170   :  { %v1804_v35 = vadd.f32 %v1803_v31, %v1790_v32  ;;  %2352 = vmatmul.bf16.vlgmr.msra.gmra.mxu2 %v1868_v11 }
 0x172   :  { %v1818_v44 = vadd.f32 %v1817_v33, %v1804_v35 }
 0x176   :  { %v1831_v40 = vpop.f32.mrf.mxu2  ;;  %v1845_v45 = vpop.f32.mrf.mxu3 }
 0x177   :  { %v1805_v46 = vpop.f32.mrf.mxu0  ;;  %v1832_v47 = vadd.f32 %v1831_v40, %v1818_v44  ;;  %v1819_v49 = vpop.f32.mrf.mxu1 }
 0x178   :  { %v1806_v48 = vadd.f32 %v1805_v46, %v1792_v41 }
 0x179   :  { %v1846_v50 = vadd.f32 %v1845_v45, %v1832_v47 }
 0x17a   :  { %v1820_v51 = vadd.f32 %v1819_v49, %v1806_v48  ;;  %v3932_v49 = vld [vmem:[#allocation2] ss:$0 sm:$0xff] }
 0x17b   :  { %v1853_v1 = vmul.f32 0.2, %v1846_v50 }
 0x17d   :  { %v1861_v55 = vmax.f32 %v1846_v50, %v1853_v1 }
 0x17e   :  { %v1833_v12 = vpop.f32.mrf.mxu2  ;;  %v1847_v53 = vpop.f32.mrf.mxu3 }
 0x17f   :  { %v1834_v52 = vadd.f32 %v1833_v12, %v1820_v51 }
 0x181   :  { %v1848_v58 = vadd.f32 %v1847_v53, %v1834_v52 }
 0x183   :  { %v1857_v21 = vmul.f32 0.2, %v1848_v58 }
 0x185   :  { %v1865_v56 = vmax.f32 %v1848_v58, %v1857_v21 }
 0x187   :  { %v1869_v57 = vpack.c.bf16 %v1865_v56, %v1861_v55 }
 0x189   :  { %2310 = vmatmul.bf16.vlgmr.msrb.gmra.mxu3 %v1869_v57 }
 0x18d   :  { %v2269_v59 = vpop.f32.mrf.mxu0 }
 0x18e   :  { %v2270_v5 = vadd.f32 %v2269_v59, %v1936_v54 }
 0x195   :  { %v2271_v62 = vpop.f32.mrf.mxu0 }
 0x196   :  { %v2272_v16 = vadd.f32 %v2271_v62, %v1936_v54 }
 0x199   :  { %2366 = vmatmul.bf16.vlgmr.msra.gmra.mxu3 %v1869_v57 }
 0x1a0   :  { %v2283_v60 = vpop.f32.mrf.mxu1 }
 0x1a1   :  { %v2284_v7 = vadd.f32 %v2283_v60, %v2270_v5 }
 0x1a8   :  { %v2285_v0 = vpop.f32.mrf.mxu1 }
 0x1a9   :  { %v2286_v19 = vadd.f32 %v2285_v0, %v2272_v16 }
 0x1ad   :  { %v2325_v6 = vpop.f32.mrf.mxu0 }
 0x1ae   :  { %v2326_v15 = vadd.f32 %v2325_v6, %v1937_v8 }
 0x1b0   :  { %v2339_v9 = vpop.f32.mrf.mxu1 }
 0x1b1   :  { %v2340_v17 = vadd.f32 %v2339_v9, %v2326_v15 }
 0x1b5   :  { %v2327_v24 = vpop.f32.mrf.mxu0 }
 0x1b6   :  { %v2328_v43 = vadd.f32 %v2327_v24, %v1937_v8 }
 0x1b8   :  { %v2341_v27 = vpop.f32.mrf.mxu1 }
 0x1b9   :  { %v2342_v18 = vadd.f32 %v2341_v27, %v2328_v43 }
 0x1e3   :  { %v2297_v61 = vpop.f32.mrf.mxu2 }
 0x1e4   :  { %v2298_v13 = vadd.f32 %v2297_v61, %v2284_v7 }
 0x1eb   :  { %v2299_v2 = vpop.f32.mrf.mxu2 }
 0x1ec   :  { %v2300_v38 = vadd.f32 %v2299_v2, %v2286_v19 }
 0x1f3   :  { %v2353_v14 = vpop.f32.mrf.mxu2 }
 0x1f4   :  { %v2354_v20 = vadd.f32 %v2353_v14, %v2340_v17 }
 0x1fb   :  { %v2355_v31 = vpop.f32.mrf.mxu2 }
 0x1fc   :  { %v2356_v33 = vadd.f32 %v2355_v31, %v2342_v18 }
 0x20c   :  { %v2311_v4 = vpop.f32.mrf.mxu3 }
 0x20d   :  { %v2312_v3 = vadd.f32 %v2311_v4, %v2298_v13 }
 0x20f   :  { %v2372_v22 = vmul.f32 0.2, %v2312_v3 }
 0x211   :  { %v2376_v10 = vmax.f32 %v2312_v3, %v2372_v22 }
 0x213   :  { %v2386_v35 = vmul.f32 %v2382_v28, %v2376_v10 }
 0x214   :  { %v2313_v11 = vpop.f32.mrf.mxu3 }
 0x215   :  { %v2314_v29 = vadd.f32 %v2313_v11, %v2300_v38 }
 0x217   :  { %v2374_v34 = vmul.f32 0.2, %v2314_v29 }
 0x219   :  { %v2378_v41 = vmax.f32 %v2314_v29, %v2374_v34 }
 0x21b   :  { %v2388_v46 = vmul.f32 %v2382_v28, %v2378_v41 }
 0x21c   :  { %v2367_v25 = vpop.f32.mrf.mxu3 }
 0x21d   :  { %v2368_v26 = vadd.f32 %v2367_v25, %v2354_v20 }
 0x21f   :  { %v2373_v30 = vmul.f32 0.2, %v2368_v26 }
 0x221   :  { %v2377_v32 = vmax.f32 %v2368_v26, %v2373_v30 }
 0x223   :  { %v2387_v36 = vmul.f32 %v2383_v42, %v2377_v32 }
 0x224   :  { %v2369_v37 = vpop.f32.mrf.mxu3 }
 0x225   :  { %v2370_v39 = vadd.f32 %v2369_v37, %v2356_v33  ;;  %v2390_v40 = vadd.f32 %v2387_v36, %v2386_v35 }
 0x227   :  { %v2375_v44 = vmul.f32 0.2, %v2370_v39  ;;  %2391 = vadd.xlane.f32.xlu0 %v2390_v40 }
 0x229   :  { %v2379_v45 = vmax.f32 %v2370_v39, %v2375_v44 }
 0x22b   :  { %v2389_v47 = vmul.f32 %v2383_v42, %v2379_v45 }
 0x22d   :  { %v2393_v48 = vadd.f32 %v2389_v47, %v2388_v46 }
 0x22f   :  { %2394 = vadd.xlane.f32.xlu0 %v2393_v48 }
 0x29a   :  { %v2392_v50 = vpop.xlane.xlu0 %2391 }
 0x29b   :  { %v2400_v51 = vadd.f32 %v3932_v49, %v2392_v50 }
 0x29d   :  { %v3629_v12 = vmul.f32 -1.442695, %v2400_v51 }
 0x29f   :  { %3933 = vpow2.f32 %v3629_v12 }
 0x2a2   :  { %v2395_v52 = vpop.xlane.xlu0 %2394 }
 0x2a3   :  { %v2401_v53 = vadd.f32 %v3932_v49, %v2395_v52 }
 0x2a5   :  { %v3934_v1 = vpop.eup %3933  ;;  %v3630_v58 = vmul.f32 -1.442695, %v2401_v53 }
 0x2a6   :  { %v2408_v21 = vadd.f32 1.0, %v3934_v1 }
 0x2a7   :  { %3935 = vpow2.f32 %v3630_v58 }
 0x2a8   :  { %3937 = vrcp.f32 %v2408_v21  ;;  %v2421_v61 = vand.u32 2147483648, %v2408_v21  ;;  %v2419_v63 = vand.u32 2147483647, %v2408_v21  ;;  %vm2415_vm1 = vweird.f32 %v2408_v21 }
 0x2aa   :  { %v2422_v4 = vor.u32 1.1754944e-38, %v2421_v61  ;;  %vm2420_vm4 = vcmp.eq.f32.partialorder %v2419_v63, 8.507059e+37 }
 0x2ad   :  { %v3936_v55 = vpop.eup %3935 }
 0x2ae   :  { %v3938_v56 = vpop.eup %3937  ;;  %v2409_v57 = vadd.f32 1.0, %v3936_v55 }
 0x2af   :  { %v2411_v59 = vmul.f32 %v3938_v56, %v2408_v21  ;;  %vm2416_vm0 = vweird.f32 %v3938_v56 }
 0x2b0   :  { %3939 = vrcp.f32 %v2409_v57  ;;  %vm2417_vm3 = vmor %vm2415_vm1, %vm2416_vm0  ;;  %v2436_v8 = vand.u32 2147483648, %v2409_v57  ;;  %v2434_v11 = vand.u32 2147483647, %v2409_v57  ;;  %vm2430_vm6 = vweird.f32 %v2409_v57 }
 0x2b1   :  { %v2412_v60 = vsub.f32 1.0, %v2411_v59 }
 0x2b2   :  { %v2437_v14 = vor.u32 1.1754944e-38, %v2436_v8  ;;  %vm2435_vm8 = vcmp.eq.f32.partialorder %v2434_v11, 8.507059e+37 }
 0x2b3   :  { %v2413_v62 = vmul.f32 %v3938_v56, %v2412_v60 }
 0x2b5   :  { %v2414_v0 = vadd.f32 %v3938_v56, %v2413_v62 }
 0x2b6   :  { %v3940_v2 = vpop.eup %3939 }
 0x2b7   :  { %v2418_v54 = vsel %vm2417_vm3, %v3938_v56, %v2414_v0  ;;  %v2426_v5 = vmul.f32 %v3940_v2, %v2409_v57  ;;  %vm2431_vm5 = vweird.f32 %v3940_v2 }
 0x2b8   :  { %v2423_v6 = vsel %vm2420_vm4, %v2422_v4, %v2418_v54  ;;  %vm2432_vm7 = vmor %vm2430_vm6, %vm2431_vm5 }
 0x2b9   :  { %2441 = vst.msk [vmem:[%s4175_s7] sm:$0xff] %vm2440_vm2, %v2423_v6  ;;  %v2427_v7 = vsub.f32 1.0, %v2426_v5 }
 0x2bb   :  { %v2428_v9 = vmul.f32 %v3940_v2, %v2427_v7 }
 0x2bd   :  { %v2429_v13 = vadd.f32 %v3940_v2, %v2428_v9 }
 0x2bf   :  { %v2433_v15 = vsel %vm2432_vm7, %v3940_v2, %v2429_v13 }
 0x2c0   :  { %v2438_v3 = vsel %vm2435_vm8, %v2437_v14, %v2433_v15 }
 0x2c1   :  { %2442 = vst.msk [vmem:[%s4175_s7 + $0x8] sm:$0xff] %vm2440_vm2, %v2438_v3 }
 0x2c2   :  { %2447 = vsyncpa [#allocation4], 1 }
 0x2c3   :  { %2448 = vsyncpa [#allocation6], 1 }

</bundles_post_ra>
